<compile_context>
chip_gen: v5e
topology: v5e:2x2
jax: 0.10.0
libtpu: 0.0.40
codegen_flags: <defaults>
</compile_context>

<pallas_src>
import functools

import jax
import jax.numpy as jnp
from jax.experimental import pallas as pl
from jax.experimental.pallas import tpu as pltpu

BN_EPS = 1e-5


# ---------------------------------------------------------------------------
# helpers
# ---------------------------------------------------------------------------
def _round_up(x, m):
    return ((x + m - 1) // m) * m


def _choose_tile(dim, preferred, align):
    """Tile = `preferred` when the dim is large, else the whole (aligned) dim."""
    if dim >= preferred:
        return preferred
    return _round_up(dim, align)


# ---------------------------------------------------------------------------
# Pallas kernel: tiled  (M,K)@(K,Cout)  with fused BN scale/shift + activation
# ---------------------------------------------------------------------------
def _fused_matmul_kernel(x_ref, w_ref, s_ref, t_ref, o_ref, acc_ref, *, act):
    k = pl.program_id(2)

    @pl.when(k == 0)
    def _():
        acc_ref[...] = jnp.zeros_like(acc_ref)

    # bf16 x bf16 -> f32 accumulation on the MXU.
    acc_ref[...] += jnp.dot(
        x_ref[...], w_ref[...], preferred_element_type=jnp.float32
    )

    @pl.when(k == pl.num_programs(2) - 1)
    def _():
        acc = acc_ref[...] * s_ref[...] + t_ref[...]
        if act == "relu":
            acc = jnp.maximum(acc, 0.0)
        elif act == "sigmoid":
            acc = jax.nn.sigmoid(acc)
        o_ref[...] = acc.astype(o_ref.dtype)


def fused_matmul(lhs, rhs, scale, shift, act="relu", out_dtype=jnp.float32):
    """lhs: (M, K), rhs: (K, Cout), scale/shift: (Cout,).  Returns (M, Cout) f32."""
    M, K = lhs.shape
    K2, Cout = rhs.shape
    assert K == K2

    # Tile sizes (multiples of 8 / 128), conservative enough for v7x VMEM.
    tm = _choose_tile(M, 512, 8)
    tk = _choose_tile(K, 512, 128)
    nb = _choose_tile(Cout, 256, 128)

    M_pad = _round_up(M, tm)
    K_pad = _round_up(K, tk)
    N_pad = _round_up(Cout, nb)

    # Zero padding is exact for the matmul; padded rows/cols are sliced off.
    lhs_p = jnp.pad(lhs, ((0, M_pad - M), (0, K_pad - K))).astype(jnp.bfloat16)
    rhs_p = jnp.pad(rhs, ((0, K_pad - K), (0, N_pad - Cout))).astype(jnp.bfloat16)
    s2 = jnp.pad(scale.astype(jnp.float32), (0, N_pad - Cout)).reshape(1, N_pad)
    t2 = jnp.pad(shift.astype(jnp.float32), (0, N_pad - Cout)).reshape(1, N_pad)

    grid = (M_pad // tm, N_pad // nb, K_pad // tk)

    out = pl.pallas_call(
        functools.partial(_fused_matmul_kernel, act=act),
        out_shape=jax.ShapeDtypeStruct((M_pad, N_pad), out_dtype),
        grid_spec=pltpu.PrefetchScalarGridSpec(
            num_scalar_prefetch=0,
            grid=grid,
            in_specs=[
                pl.BlockSpec((tm, tk), lambda i, j, k: (i, k)),
                pl.BlockSpec((tk, nb), lambda i, j, k: (k, j)),
                pl.BlockSpec((1, nb), lambda i, j, k: (0, j)),
                pl.BlockSpec((1, nb), lambda i, j, k: (0, j)),
            ],
            out_specs=pl.BlockSpec((tm, nb), lambda i, j, k: (i, j)),
            scratch_shapes=[pltpu.VMEM((tm, nb), jnp.float32)],
        ),
        compiler_params=pltpu.CompilerParams(
            dimension_semantics=("parallel", "parallel", "arbitrary"),
            vmem_limit_bytes=48 * 1024 * 1024,
        ),
    )(lhs_p, rhs_p, s2, t2)

    return out[:M, :Cout]


# ---------------------------------------------------------------------------
# up_conv forward: Upsample(2x nearest) -> Conv3x3(pad=1)+BN+ReLU (fused)
# ---------------------------------------------------------------------------
def up_conv_forward(params, x_nchw):
    # NCHW -> NHWC; keep activations bf16 until the kernel (accumulate f32).
    x = jnp.transpose(x_nchw, (0, 2, 3, 1)).astype(jnp.bfloat16)
    N, H, W, Cin = x.shape
    Ho, Wo = 2 * H, 2 * W

    # nearest-neighbour 2x upsample via a single broadcast + reshape.
    xu = jnp.broadcast_to(
        x[:, :, None, :, None, :], (N, H, 2, W, 2, Cin)
    ).reshape(N, Ho, Wo, Cin)

    # 3x3 conv, padding=1: zero-pad then im2col (bf16), ordering (ky, kx, cin)
    # to match w.reshape(9*Cin, Cout).
    xp = jnp.pad(xu, ((0, 0), (1, 1), (1, 1), (0, 0)))
    cols = jnp.concatenate(
        [xp[:, dy:dy + Ho, dx:dx + Wo, :] for dy in range(3) for dx in range(3)],
        axis=-1,
    )
    lhs = cols.reshape(N * Ho * Wo, 9 * Cin)

    Cout = params["w"].shape[-1]
    rhs = params["w"].reshape(9 * Cin, Cout)

    # Fold conv bias + inference-mode BatchNorm into per-channel scale/shift.
    scale = params["gamma"] / jnp.sqrt(params["var"] + BN_EPS)
    shift = (params["b"] - params["mean"]) * scale + params["beta"]

    out = fused_matmul(lhs, rhs, scale, shift, act="relu", out_dtype=jnp.float32)
    out = out.reshape(N, Ho, Wo, Cout)
    return jnp.transpose(out, (0, 3, 1, 2))  # NHWC -> NCHW


# ---------------------------------------------------------------------------
# Deterministic parameter init (He-scaled conv, PyTorch-default BN stats)
# ---------------------------------------------------------------------------
def init_up_conv(key, in_ch, out_ch):
    kw, kb = jax.random.split(key)
    w = jax.random.normal(kw, (3, 3, in_ch, out_ch), jnp.float32) * jnp.sqrt(
        2.0 / (9.0 * in_ch)
    )
    b = 0.01 * jax.random.normal(kb, (out_ch,), jnp.float32)
    return dict(
        w=w,
        b=b,
        gamma=jnp.ones((out_ch,), jnp.float32),
        beta=jnp.zeros((out_ch,), jnp.float32),
        mean=jnp.zeros((out_ch,), jnp.float32),
        var=jnp.ones((out_ch,), jnp.float32),
    )


# ---------------------------------------------------------------------------
if __name__ == "__main__":
    key = jax.random.PRNGKey(0)
    k_params, k_x = jax.random.split(key)

    in_ch, out_ch = 32, 16  # up_conv(in_ch=32, out_ch=16)
    params = init_up_conv(k_params, in_ch, out_ch)

    # NCHW input, small spatial size; output is (N, out_ch, 2H, 2W).
    x = jax.random.normal(k_x, (2, in_ch, 16, 16), jnp.float32)

    fwd = jax.jit(up_conv_forward)
    out = jax.block_until_ready(fwd(params, x))

    assert out.shape == (2, out_ch, 32, 32), out.shape
    assert bool(jnp.all(jnp.isfinite(out)))
    assert bool(jnp.all(out >= 0.0))  # ReLU output range
    print("KERNEL_OK")
</pallas_src>

<mosaic_0001>
module attributes {stable_mosaic.version = 11 : i64} {
  func.func @_fused_matmul_kernel(%arg0: i32, %arg1: i32, %arg2: i32, %arg3: memref<512x384xbf16, #tpu.memory_space<vmem>>, %arg4: memref<384x128xbf16, #tpu.memory_space<vmem>>, %arg5: memref<1x128xf32, #tpu.memory_space<vmem>>, %arg6: memref<1x128xf32, #tpu.memory_space<vmem>>, %arg7: memref<512x128xf32, #tpu.memory_space<vmem>>, %arg8: memref<512x128xf32, #tpu.memory_space<vmem>>) attributes {dimension_semantics = [#tpu.dimension_semantics<parallel>, #tpu.dimension_semantics<parallel>, #tpu.dimension_semantics<arbitrary>], iteration_bounds = array<i64: 4, 1, 1>, scalar_prefetch = 0 : i64, scratch_operands = 1 : i64, tpu.core_type = #tpu.core_type<tc>, window_params = [{transform_indices = @transform_0, window_bounds = array<i64: 512, 384>}, {transform_indices = @transform_1, window_bounds = array<i64: 384, 128>}, {transform_indices = @transform_2, window_bounds = array<i64: 1, 128>}, {transform_indices = @transform_3, window_bounds = array<i64: 1, 128>}, {transform_indices = @transform_4, window_bounds = array<i64: 512, 128>}]} {
    %c0_i32 = arith.constant 0 : i32
    %0 = arith.cmpi eq, %arg2, %c0_i32 : i32
    %1 = arith.extui %0 : i1 to i32
    %c0_i32_0 = arith.constant 0 : i32
    %2 = arith.cmpi ne, %1, %c0_i32_0 : i32
    scf.if %2 {
      %cst_10 = arith.constant 0.000000e+00 : f32
      %12 = vector.broadcast %cst_10 : f32 to vector<512x128xf32>
      %c0_11 = arith.constant 0 : index
      %c0_12 = arith.constant 0 : index
      %13 = vector.load %arg8[%c0_11, %c0_12] : memref<512x128xf32, #tpu.memory_space<vmem>>, vector<512x128xf32>
      tpu.vector_store %arg8[%c0_11, %c0_12], %12 {strides = array<i32>} : memref<512x128xf32, #tpu.memory_space<vmem>>, vector<512x128xf32>,
    } else {
    }
    %c0 = arith.constant 0 : index
    %c0_1 = arith.constant 0 : index
    %3 = vector.load %arg8[%c0, %c0_1] : memref<512x128xf32, #tpu.memory_space<vmem>>, vector<512x128xf32>
    %c0_2 = arith.constant 0 : index
    %c0_3 = arith.constant 0 : index
    %4 = vector.load %arg3[%c0_2, %c0_3] : memref<512x384xbf16, #tpu.memory_space<vmem>>, vector<512x384xbf16>
    %c0_4 = arith.constant 0 : index
    %c0_5 = arith.constant 0 : index
    %5 = vector.load %arg4[%c0_4, %c0_5] : memref<384x128xbf16, #tpu.memory_space<vmem>>, vector<384x128xbf16>
    %cst = arith.constant dense<0.000000e+00> : vector<512x128xf32>
    %6 = tpu.matmul %4, %5, %cst {dimension_numbers = #tpu.dot_dimension_numbers<[1], [0], [0], [1], [0, 0, 1, 1], [], []>} : vector<512x384xbf16>, vector<384x128xbf16>, vector<512x128xf32> -> vector<512x128xf32>
    %7 = arith.addf %3, %6 : vector<512x128xf32>
    %c0_6 = arith.constant 0 : index
    %c0_7 = arith.constant 0 : index
    %8 = vector.load %arg8[%c0_6, %c0_7] : memref<512x128xf32, #tpu.memory_space<vmem>>, vector<512x128xf32>
    tpu.vector_store %arg8[%c0_6, %c0_7], %7 {strides = array<i32>} : memref<512x128xf32, #tpu.memory_space<vmem>>, vector<512x128xf32>,
    %c0_i32_8 = arith.constant 0 : i32
    %9 = arith.cmpi eq, %arg2, %c0_i32_8 : i32
    %10 = arith.extui %9 : i1 to i32
    %c0_i32_9 = arith.constant 0 : i32
    %11 = arith.cmpi ne, %10, %c0_i32_9 : i32
    scf.if %11 {
      %c0_10 = arith.constant 0 : index
      %c0_11 = arith.constant 0 : index
      %12 = vector.load %arg8[%c0_10, %c0_11] : memref<512x128xf32, #tpu.memory_space<vmem>>, vector<512x128xf32>
      %c0_12 = arith.constant 0 : index
      %c0_13 = arith.constant 0 : index
      %13 = vector.load %arg5[%c0_12, %c0_13] : memref<1x128xf32, #tpu.memory_space<vmem>>, vector<1x128xf32>
      %14 = vector.broadcast %13 : vector<1x128xf32> to vector<512x128xf32>
      %15 = arith.mulf %12, %14 : vector<512x128xf32>
      %c0_14 = arith.constant 0 : index
      %c0_15 = arith.constant 0 : index
      %16 = vector.load %arg6[%c0_14, %c0_15] : memref<1x128xf32, #tpu.memory_space<vmem>>, vector<1x128xf32>
      %17 = vector.broadcast %16 : vector<1x128xf32> to vector<512x128xf32>
      %18 = arith.addf %15, %17 : vector<512x128xf32>
      %cst_16 = arith.constant 0.000000e+00 : f32
      %19 = vector.broadcast %cst_16 : f32 to vector<512x128xf32>
      %20 = arith.maximumf %18, %19 : vector<512x128xf32>
      %c0_17 = arith.constant 0 : index
      %c0_18 = arith.constant 0 : index
      %21 = vector.load %arg7[%c0_17, %c0_18] : memref<512x128xf32, #tpu.memory_space<vmem>>, vector<512x128xf32>
      tpu.vector_store %arg7[%c0_17, %c0_18], %20 {strides = array<i32>} : memref<512x128xf32, #tpu.memory_space<vmem>>, vector<512x128xf32>,
    } else {
    }
    return
  }
  func.func @transform_0(%arg0: i32, %arg1: i32, %arg2: i32) -> (i32, i32) {
    %c0_i32 = arith.constant 0 : i32
    return %arg0, %arg2 : i32, i32
  }
  func.func @transform_1(%arg0: i32, %arg1: i32, %arg2: i32) -> (i32, i32) {
    %c0_i32 = arith.constant 0 : i32
    return %arg2, %arg1 : i32, i32
  }
  func.func @transform_2(%arg0: i32, %arg1: i32, %arg2: i32) -> (i32, i32) {
    %c0_i32 = arith.constant 0 : i32
    %c0_i32_0 = arith.constant 0 : i32
    return %c0_i32, %arg1 : i32, i32
  }
  func.func @transform_3(%arg0: i32, %arg1: i32, %arg2: i32) -> (i32, i32) {
    %c0_i32 = arith.constant 0 : i32
    %c0_i32_0 = arith.constant 0 : i32
    return %c0_i32, %arg1 : i32, i32
  }
  func.func @transform_4(%arg0: i32, %arg1: i32, %arg2: i32) -> (i32, i32) {
    %c0_i32 = arith.constant 0 : i32
    return %arg0, %arg1 : i32, i32
  }
}

</mosaic_0001>

<bundles_post_ra>
// kernel: up_conv_forward.1
= control target key start
LH: loop header
LB: loop body
LE: loop exit
PB: predicated region body
PF: predicated region fallthrough
CT: control target
= control target key end

     0   :  { %s3080_s15 = smov 0   ;;  %s3082_s16 = smov 0   ;;  %s3744_s0 = inlined_call_operand.vmem [shape: bf16[2048,384], index: 0, kind: input, shape index: {}]   ;;  %s3745_s1 = inlined_call_operand.vmem [shape: bf16[384,128], index: 1, kind: input, shape index: {}]   ;;  %s3746_s2 = inlined_call_operand.vmem [shape: f32[1,128], index: 2, kind: input, shape index: {}]   ;;  %s3747_s3 = inlined_call_operand.vmem [shape: f32[1,128], index: 3, kind: input, shape index: {}]   ;;  %s3748_s4 = inlined_call_operand.vmem [shape: f32[2048,128], index: 4, kind: output, shape index: {}]  }
   0x1   :  { %s3084_s17 = smov 0  }
   0x2 LB: > { %s33_s18 = sadd.s32 1, %s3049_s16  ;;  %p2371_p0 = scmp.ge.s32.totalorder %s3053_s17, 1  ;;  %s3053_s17 = sphi %s3084_s17, %s14_s17   ;;  %s3049_s16 = sphi %s3082_s16, %s3750_s16   ;;  %s3045_s15 = sphi %s3080_s15, %s3749_s15  }
   0x3   : > { %p35_p1 = scmp.ge.s32.totalorder %s33_s18, 4  ;;  %p224_p2 = scmp.lt.s32.totalorder %s3053_s17, 5 }
   0x5   : > { %s3752_s18 = smov (%p35_p1, %s33_s18), 0  ;;  %p225_p3 = pnand %p2371_p0, %p224_p2 }
   0x6   : > { %s2372_s11 = sshll.u32 (!%p225_p3), %s3045_s15, 6 }
   0x7   : > { %228 = sbr.rel (%p225_p3) target bundleno = 563 (0x233), region = 36  ;;  %p274_p4 = scmp.lt.s32.totalorder (!%p225_p3), %s2372_s11, 255 }
   0xc   : > { %v2961_v0 = vld [vmem:[%s3745_s1 + $0x38] sm:$0xff]  ;;  %v2960_v3 = vld [vmem:[%s3745_s1 + $0x30] sm:$0xff]  ;;  %v2959_v6 = vld [vmem:[%s3745_s1 + $0x28] sm:$0xff]  ;;  %s3754_s11 = smov (!%p274_p4, %s2372_s11), 255 }
   0xd   : > { %v3106_v1 = vld [vmem:[%s3745_s1 + $0x78] sm:$0xff]  ;;  %1272 = vmatpush.bf16.msra.mxu0 %v2961_v0  ;;  %2978 = vmatpush.bf16.msra.mxu3 %v2961_v0  ;;  %v3121_v4 = vld [vmem:[%s3745_s1 + $0x70] sm:$0xff]  ;;  %v3136_v7 = vld [vmem:[%s3745_s1 + $0x68] sm:$0xff]  ;;  %s3002_s29 = smul.u32 12, %s3754_s11  ;;  %s2375_s5 = sshll.u32 %s3754_s11, 3 }
   0xe   : > { %v3111_v2 = vld [vmem:[%s3745_s1 + $0xb8] sm:$0xff]  ;;  %1441 = vmatpush.bf16.msra.mxu1 %v3106_v1  ;;  %v3126_v5 = vld [vmem:[%s3745_s1 + $0xb0] sm:$0xff]  ;;  %v3141_v8 = vld [vmem:[%s3745_s1 + $0xa8] sm:$0xff]  ;;  %s3324_s8 = scalar_lea.vmem %s3748_s4, %s2375_s5 }
   0xf   : > { %1610 = vmatpush.bf16.msra.mxu2 %v3111_v2  ;;  %v2958_v9 = vld [vmem:[%s3745_s1 + $0x20] sm:$0xff]  ;;  %v2957_v12 = vld [vmem:[%s3745_s1 + $0x18] sm:$0xff]  ;;  %v2956_v15 = vld [vmem:[%s3745_s1 + $0x10] sm:$0xff]  ;;  %s3193_s13 = scalar_lea.vmem %s3744_s0, %s3002_s29 }
  0x10   : > { %v3150_v10 = vld [vmem:[%s3745_s1 + $0x60] sm:$0xff]  ;;  %v2965_v13 = vld [vmem:[%s3745_s1 + $0x58] sm:$0xff]  ;;  %v2964_v16 = vld [vmem:[%s3745_s1 + $0x50] sm:$0xff] }
  0x11   : > { %1273 = vmatpush.bf16.msra.mxu0 %v2960_v3  ;;  %2979 = vmatpush.bf16.msra.mxu3 %v2960_v3  ;;  %v3157_v11 = vld [vmem:[%s3745_s1 + $0xa0] sm:$0xff]  ;;  %v3172_v14 = vld [vmem:[%s3745_s1 + $0x98] sm:$0xff]  ;;  %v3185_v17 = vld [vmem:[%s3745_s1 + $0x90] sm:$0xff] }
  0x12   : > { %1442 = vmatpush.bf16.msra.mxu1 %v3121_v4  ;;  %v2955_v18 = vld [vmem:[%s3745_s1 + $0x8] sm:$0xff]  ;;  %v2954_v21 = vld [vmem:[%s3745_s1] sm:$0xff]  ;;  %v2380_v29 = vld [vmem:[%s3193_s13 + $0xc] sm:$0xf0] }
  0x13   : > { %1611 = vmatpush.bf16.msra.mxu2 %v3126_v5  ;;  %v2963_v19 = vld [vmem:[%s3745_s1 + $0x48] sm:$0xff]  ;;  %v2962_v22 = vld [vmem:[%s3745_s1 + $0x40] sm:$0xff]  ;;  %v2860_v31 = vld [vmem:[%s3193_s13 + $0x10] sm:$0xf0] }
  0x14   : > { %v3202_v20 = vld [vmem:[%s3745_s1 + $0x88] sm:$0xff]  ;;  %v3213_v23 = vld [vmem:[%s3745_s1 + $0x80] sm:$0xff]  ;;  %v2390_v36 = vld [vmem:[%s3193_s13 + $0x18] sm:$0xf] }
  0x15   : > { %1274 = vmatpush.bf16.msra.mxu0 %v2959_v6  ;;  %2980 = vmatpush.bf16.msra.mxu3 %v2959_v6  ;;  %v2378_v24 = vld [vmem:[%s3193_s13] sm:$0xf]  ;;  %v2859_v25 = vld [vmem:[%s3193_s13 + $0x8] sm:$0xf0]  ;;  %v2858_v28 = vld [vmem:[%s3193_s13 + $0x4] sm:$0xf] }
  0x16   : > { %1443 = vmatpush.bf16.msra.mxu1 %v3136_v7  ;;  %v2666_v26 = vld [vmem:[%s3193_s13 + $0x240] sm:$0xf]  ;;  %v2931_v27 = vld [vmem:[%s3193_s13 + $0x248] sm:$0xf0]  ;;  %v2386_v30 = vld [vmem:[%s3193_s13 + $0x8] sm:$0xf]  ;;  %v2379_v32 = vor.u32 %v2859_v25, %v2378_v24  ;;  %v2383_v34 = vor.u32 %v2858_v28, %v2380_v29 }
  0x17   : > { %1612 = vmatpush.bf16.msra.mxu2 %v3141_v8  ;;  %v2667_v33 = vor.u32 %v2931_v27, %v2666_v26  ;;  %v2387_v35 = vor.u32 %v2860_v31, %v2386_v30  ;;  %v2862_v37 = vld [vmem:[%s3193_s13 + $0x20] sm:$0xf0]  ;;  %v2678_v38 = vld [vmem:[%s3193_s13 + $0x258] sm:$0xf]  ;;  %v2861_v40 = vld [vmem:[%s3193_s13 + $0x1c] sm:$0xf] }
  0x18   : > { %v2934_v39 = vld [vmem:[%s3193_s13 + $0x260] sm:$0xf0]  ;;  %v2392_v41 = vld [vmem:[%s3193_s13 + $0x24] sm:$0xf0]  ;;  %v2398_v42 = vld [vmem:[%s3193_s13 + $0x20] sm:$0xf]  ;;  %v2391_v44 = vor.u32 %v2862_v37, %v2390_v36 }
  0x19   : > { %1275 = vmatpush.bf16.msra.mxu0 %v2958_v9  ;;  %2981 = vmatpush.bf16.msra.mxu3 %v2958_v9  ;;  %v2863_v43 = vld [vmem:[%s3193_s13 + $0x28] sm:$0xf0]  ;;  %v2679_v45 = vor.u32 %v2934_v39, %v2678_v38  ;;  %v2395_v46 = vor.u32 %v2861_v40, %v2392_v41  ;;  %v2402_v48 = vld [vmem:[%s3193_s13 + $0x30] sm:$0xf]  ;;  %v2865_v49 = vld [vmem:[%s3193_s13 + $0x38] sm:$0xf0] }
  0x1a   : > { %1444 = vmatpush.bf16.msra.mxu1 %v3150_v10  ;;  %v2399_v47 = vor.u32 %v2863_v43, %v2398_v42  ;;  %v2690_v50 = vld [vmem:[%s3193_s13 + $0x270] sm:$0xf]  ;;  %v2937_v51 = vld [vmem:[%s3193_s13 + $0x278] sm:$0xf0]  ;;  %v2864_v52 = vld [vmem:[%s3193_s13 + $0x34] sm:$0xf]  ;;  %v2403_v56 = vor.u32 %v2865_v49, %v2402_v48 }
  0x1b   : > { %1613 = vmatpush.bf16.msra.mxu2 %v3157_v11  ;;  %v2404_v53 = vld [vmem:[%s3193_s13 + $0x3c] sm:$0xf0]  ;;  %v2410_v54 = vld [vmem:[%s3193_s13 + $0x38] sm:$0xf]  ;;  %v2866_v55 = vld [vmem:[%s3193_s13 + $0x40] sm:$0xf0]  ;;  %v2691_v57 = vor.u32 %v2937_v51, %v2690_v50 }
  0x1c   : > { %v2407_v58 = vor.u32 %v2864_v52, %v2404_v53  ;;  %v2411_v59 = vor.u32 %v2866_v55, %v2410_v54  ;;  %v2414_v60 = vld [vmem:[%s3193_s13 + $0x48] sm:$0xf]  ;;  %v2868_v61 = vld [vmem:[%s3193_s13 + $0x50] sm:$0xf0]  ;;  %v2867_v0 = vld [vmem:[%s3193_s13 + $0x4c] sm:$0xf] }
  0x1d   : > { %1276 = vmatpush.bf16.msra.mxu0 %v2957_v12  ;;  %2982 = vmatpush.bf16.msra.mxu3 %v2957_v12  ;;  %v2702_v62 = vld [vmem:[%s3193_s13 + $0x288] sm:$0xf]  ;;  %v2940_v63 = vld [vmem:[%s3193_s13 + $0x290] sm:$0xf0]  ;;  %v2869_v3 = vld [vmem:[%s3193_s13 + $0x58] sm:$0xf0] }
  0x1e   : > { %1445 = vmatpush.bf16.msra.mxu1 %v2965_v13  ;;  %v2871_v9 = vld [vmem:[%s3193_s13 + $0x68] sm:$0xf0]  ;;  %v2870_v12 = vld [vmem:[%s3193_s13 + $0x64] sm:$0xf]  ;;  %v2873_v25 = vld [vmem:[%s3193_s13 + $0x7c] sm:$0xf] }
  0x1f   : > { %1614 = vmatpush.bf16.msra.mxu2 %v3172_v14  ;;  %v2946_v24 = vld [vmem:[%s3193_s13 + $0x2c0] sm:$0xf0]  ;;  %v2446_v26 = vld [vmem:[%s3193_s13 + $0x80] sm:$0xf]  ;;  %v2875_v27 = vld [vmem:[%s3193_s13 + $0x88] sm:$0xf0] }
  0x20   : > { %v2447_v31 = vor.u32 %v2875_v27, %v2446_v26  ;;  %v2876_v36 = vld [vmem:[%s3193_s13 + $0x94] sm:$0xf]  ;;  %v2452_v37 = vld [vmem:[%s3193_s13 + $0x9c] sm:$0xf0]  ;;  %v2458_v38 = vld [vmem:[%s3193_s13 + $0x98] sm:$0xf] }
  0x21   : > { %1277 = vmatpush.bf16.msra.mxu0 %v2956_v15  ;;  %2983 = vmatpush.bf16.msra.mxu3 %v2956_v15  ;;  %v2872_v15 = vld [vmem:[%s3193_s13 + $0x70] sm:$0xf0]  ;;  %v2878_v39 = vld [vmem:[%s3193_s13 + $0xa0] sm:$0xf0]  ;;  %v2455_v42 = vor.u32 %v2876_v36, %v2452_v37  ;;  %v2879_v48 = vld [vmem:[%s3193_s13 + $0xac] sm:$0xf] }
  0x22   : > { %1446 = vmatpush.bf16.msra.mxu1 %v2964_v16  ;;  %v2459_v43 = vor.u32 %v2878_v39, %v2458_v38  ;;  %v2464_v49 = vld [vmem:[%s3193_s13 + $0xb4] sm:$0xf0]  ;;  %v2470_v50 = vld [vmem:[%s3193_s13 + $0xb0] sm:$0xf]  ;;  %v2881_v51 = vld [vmem:[%s3193_s13 + $0xb8] sm:$0xf0] }
  0x23   : > { %1615 = vmatpush.bf16.msra.mxu2 %v3185_v17  ;;  %v2467_v54 = vor.u32 %v2879_v48, %v2464_v49  ;;  %v2471_v55 = vor.u32 %v2881_v51, %v2470_v50  ;;  %v2888_v48 = vld [vmem:[%s3193_s13 + $0xf4] sm:$0xf]  ;;  %v2692_v50 = vld [vmem:[%s3193_s13 + $0x27c] sm:$0xf0] }
  0x24   : > { %v2936_v49 = vld [vmem:[%s3193_s13 + $0x274] sm:$0xf]  ;;  %v2500_v51 = vld [vmem:[%s3193_s13 + $0xfc] sm:$0xf0] }
  0x25   : > { %1278 = vmatpush.bf16.msra.mxu0 %v2955_v18  ;;  %2984 = vmatpush.bf16.msra.mxu3 %v2955_v18 }
  0x26   : > { %1447 = vmatpush.bf16.msra.mxu1 %v2963_v19 }
  0x27   : > { %1616 = vmatpush.bf16.msra.mxu2 %v3202_v20 }
  0x29   : > { %1279 = vmatpush.bf16.msra.mxu0 %v2954_v21  ;;  %2985 = vmatpush.bf16.msra.mxu3 %v2954_v21  ;;  %v2874_v21 = vld [vmem:[%s3193_s13 + $0x80] sm:$0xf0] }
  0x2a   : > { %1448 = vmatpush.bf16.msra.mxu1 %v2962_v22 }
  0x2b   : > { %1617 = vmatpush.bf16.msra.mxu2 %v3213_v23 }
  0x2c   : > { %1280 = vmatmul.bf16.vlgmr.msra.gmra.mxu0 %v2379_v32  ;;  %1400 = vmatmul.bf16.vlgmr.msra.gmra.mxu3 %v2667_v33  ;;  %v2450_v32 = vld [vmem:[%s3193_s13 + $0x90] sm:$0xf]  ;;  %v2877_v33 = vld [vmem:[%s3193_s13 + $0x98] sm:$0xf0] }
  0x2d   : > { %2986 = vmatpush.bf16.msrb.mxu3 %v3106_v1  ;;  %1449 = vmatmul.bf16.vlgmr.msra.gmra.mxu1 %v2383_v34  ;;  %v2416_v1 = vld [vmem:[%s3193_s13 + $0x54] sm:$0xf0]  ;;  %v2738_v34 = vld [vmem:[%s3193_s13 + $0x2d0] sm:$0xf]  ;;  %v2451_v40 = vor.u32 %v2877_v33, %v2450_v32 }
  0x2e   : > { %1618 = vmatmul.bf16.vlgmr.msra.gmra.mxu2 %v2387_v35  ;;  %v2419_v6 = vor.u32 %v2867_v0, %v2416_v1  ;;  %v2949_v35 = vld [vmem:[%s3193_s13 + $0x2d8] sm:$0xf0] }
  0x2f   : > { %v2739_v41 = vor.u32 %v2949_v35, %v2738_v34 }
  0x31   : > { %2987 = vmatpush.bf16.msrb.mxu3 %v3121_v4  ;;  %v2415_v4 = vor.u32 %v2868_v61, %v2414_v60  ;;  %v2668_v60 = vld [vmem:[%s3193_s13 + $0x24c] sm:$0xf0] }
  0x32   : > { %v2476_v61 = vld [vmem:[%s3193_s13 + $0xcc] sm:$0xf0] }
  0x35   : > { %2988 = vmatpush.bf16.msrb.mxu3 %v3136_v7 }
  0x39   : > { %2989 = vmatpush.bf16.msrb.mxu3 %v3150_v10  ;;  %v2714_v10 = vld [vmem:[%s3193_s13 + $0x2a0] sm:$0xf] }
  0x3c   : > { %1285 = vmatmul.bf16.gmra.mxu0 %v2391_v44  ;;  %1405 = vmatmul.bf16.gmra.mxu3 %v2679_v45  ;;  %v2462_v44 = vld [vmem:[%s3193_s13 + $0xa8] sm:$0xf]  ;;  %v2880_v45 = vld [vmem:[%s3193_s13 + $0xb0] sm:$0xf0] }
  0x3d   : > { %2990 = vmatpush.bf16.msrb.mxu3 %v2965_v13  ;;  %1454 = vmatmul.bf16.gmra.mxu1 %v2395_v46  ;;  %v2428_v13 = vld [vmem:[%s3193_s13 + $0x6c] sm:$0xf0]  ;;  %v2750_v46 = vld [vmem:[%s3193_s13 + $0x2e8] sm:$0xf]  ;;  %v2463_v52 = vor.u32 %v2880_v45, %v2462_v44 }
  0x3e   : > { %1623 = vmatmul.bf16.gmra.mxu2 %v2399_v47  ;;  %v2431_v18 = vor.u32 %v2870_v12, %v2428_v13  ;;  %v2952_v47 = vld [vmem:[%s3193_s13 + $0x2f0] sm:$0xf0]  ;;  %v2498_v45 = vld [vmem:[%s3193_s13 + $0xf0] sm:$0xf] }
  0x3f   : > { %v2751_v53 = vor.u32 %v2952_v47, %v2750_v46  ;;  %v2889_v46 = vld [vmem:[%s3193_s13 + $0xf8] sm:$0xf0] }
  0x41   : > { %2991 = vmatpush.bf16.msrb.mxu3 %v2964_v16 }
  0x45   : > { %2992 = vmatpush.bf16.msrb.mxu3 %v2963_v19 }
  0x49   : > { %2993 = vmatpush.bf16.msrb.mxu3 %v2962_v22  ;;  %v2726_v22 = vld [vmem:[%s3193_s13 + $0x2b8] sm:$0xf] }
  0x4a   : > { %v2727_v29 = vor.u32 %v2946_v24, %v2726_v22  ;;  %v2494_v22 = vld [vmem:[%s3193_s13 + $0xe0] sm:$0xf]  ;;  %v2887_v24 = vld [vmem:[%s3193_s13 + $0xe8] sm:$0xf0] }
  0x4b   : > { %v2495_v33 = vor.u32 %v2887_v24, %v2494_v22  ;;  %v2893_v22 = vld [vmem:[%s3193_s13 + $0x118] sm:$0xf0] }
  0x4c   : > { %1290 = vmatmul.bf16.gmra.mxu0 %v2403_v56  ;;  %1410 = vmatmul.bf16.gmra.mxu3 %v2691_v57  ;;  %v2474_v56 = vld [vmem:[%s3193_s13 + $0xc0] sm:$0xf]  ;;  %v2883_v57 = vld [vmem:[%s3193_s13 + $0xc8] sm:$0xf0] }
  0x4d   : > { %2994 = vmatpush.bf16.msra.mxu3 %v3111_v2  ;;  %1459 = vmatmul.bf16.gmra.mxu1 %v2407_v58  ;;  %v2422_v2 = vld [vmem:[%s3193_s13 + $0x50] sm:$0xf]  ;;  %v2882_v58 = vld [vmem:[%s3193_s13 + $0xc4] sm:$0xf]  ;;  %v2475_v0 = vor.u32 %v2883_v57, %v2474_v56 }
  0x4e   : > { %1628 = vmatmul.bf16.gmra.mxu2 %v2411_v59  ;;  %v2423_v7 = vor.u32 %v2869_v3, %v2422_v2  ;;  %v2930_v59 = vld [vmem:[%s3193_s13 + $0x244] sm:$0xf]  ;;  %v2479_v3 = vor.u32 %v2882_v58, %v2476_v61  ;;  %v2499_v58 = vor.u32 %v2889_v46, %v2498_v45  ;;  %v2522_v46 = vld [vmem:[%s3193_s13 + $0x120] sm:$0xf] }
  0x4f   : > { %v2671_v1 = vor.u32 %v2930_v59, %v2668_v60  ;;  %v2695_v59 = vor.u32 %v2936_v49, %v2692_v50  ;;  %v2894_v49 = vld [vmem:[%s3193_s13 + $0x124] sm:$0xf] }
  0x50   : > { %v2942_v50 = vld [vmem:[%s3193_s13 + $0x2a4] sm:$0xf] }
  0x51   : > { %2995 = vmatpush.bf16.msra.mxu3 %v3126_v5  ;;  %v2703_v5 = vor.u32 %v2940_v63, %v2702_v62  ;;  %v2482_v62 = vld [vmem:[%s3193_s13 + $0xc8] sm:$0xf]  ;;  %v2884_v63 = vld [vmem:[%s3193_s13 + $0xd0] sm:$0xf0] }
  0x55   : > { %2996 = vmatpush.bf16.msra.mxu3 %v3141_v8  ;;  %v2426_v8 = vld [vmem:[%s3193_s13 + $0x60] sm:$0xf] }
  0x56   : > { %v2427_v16 = vor.u32 %v2871_v9, %v2426_v8  ;;  %v3306_v8 = vld [vmem:[%s3746_s2] ss:$0 sm:$0xff] }
  0x59   : > { %2997 = vmatpush.bf16.msra.mxu3 %v3157_v11  ;;  %v2943_v11 = vld [vmem:[%s3193_s13 + $0x2a8] sm:$0xf0] }
  0x5c   : > { %1295 = vmatmul.bf16.gmra.mxu0 %v2415_v4  ;;  %1415 = vmatmul.bf16.gmra.mxu3 %v2703_v5  ;;  %v2483_v4 = vor.u32 %v2884_v63, %v2482_v62  ;;  %v2503_v62 = vor.u32 %v2888_v48, %v2500_v51  ;;  %v2716_v51 = vld [vmem:[%s3193_s13 + $0x2ac] sm:$0xf0] }
  0x5d   : > { %2998 = vmatpush.bf16.msra.mxu3 %v3172_v14  ;;  %1464 = vmatmul.bf16.gmra.mxu1 %v2419_v6  ;;  %v2434_v14 = vld [vmem:[%s3193_s13 + $0x68] sm:$0xf] }
  0x5e   : > { %1633 = vmatmul.bf16.gmra.mxu2 %v2423_v7  ;;  %v2435_v19 = vor.u32 %v2872_v15, %v2434_v14  ;;  %v2486_v15 = vld [vmem:[%s3193_s13 + $0xd8] sm:$0xf] }
  0x61   : > { %2999 = vmatpush.bf16.msra.mxu3 %v3185_v17  ;;  %v2715_v17 = vor.u32 %v2943_v11, %v2714_v10  ;;  %v3311_v11 = vld [vmem:[%s3747_s3] ss:$0 sm:$0xff] }
  0x65   : > { %3000 = vmatpush.bf16.msra.mxu3 %v3202_v20  ;;  %v2438_v20 = vld [vmem:[%s3193_s13 + $0x78] sm:$0xf] }
  0x66   : > { %v2439_v28 = vor.u32 %v2874_v21, %v2438_v20  ;;  %v2680_v20 = vld [vmem:[%s3193_s13 + $0x264] sm:$0xf0] }
  0x67   : > { %v2488_v21 = vld [vmem:[%s3193_s13 + $0xe4] sm:$0xf0] }
  0x69   : > { %3001 = vmatpush.bf16.msra.mxu3 %v3213_v23  ;;  %v2440_v23 = vld [vmem:[%s3193_s13 + $0x84] sm:$0xf0] }
  0x6a   : > { %v2443_v30 = vor.u32 %v2873_v25, %v2440_v23 }
  0x6c   : > { %1300 = vmatmul.bf16.gmra.mxu0 %v2427_v16  ;;  %1420 = vmatmul.bf16.gmra.mxu3 %v2715_v17  ;;  %v2886_v16 = vld [vmem:[%s3193_s13 + $0xe0] sm:$0xf0] }
  0x6d   : > { %1469 = vmatmul.bf16.gmra.mxu1 %v2431_v18  ;;  %v2885_v18 = vld [vmem:[%s3193_s13 + $0xdc] sm:$0xf] }
  0x6e   : > { %1638 = vmatmul.bf16.gmra.mxu2 %v2435_v19  ;;  %v2933_v19 = vld [vmem:[%s3193_s13 + $0x25c] sm:$0xf]  ;;  %v2491_v32 = vor.u32 %v2885_v18, %v2488_v21  ;;  %v2939_v18 = vld [vmem:[%s3193_s13 + $0x28c] sm:$0xf]  ;;  %v2518_v21 = vld [vmem:[%s3193_s13 + $0x110] sm:$0xf] }
  0x7c   : > { %1305 = vmatmul.bf16.gmra.mxu0 %v2439_v28  ;;  %1425 = vmatmul.bf16.gmra.mxu3 %v2727_v29  ;;  %v2487_v28 = vor.u32 %v2886_v16, %v2486_v15  ;;  %v2683_v29 = vor.u32 %v2933_v19, %v2680_v20  ;;  %v2892_v15 = vld [vmem:[%s3193_s13 + $0x110] sm:$0xf0]  ;;  %v2704_v19 = vld [vmem:[%s3193_s13 + $0x294] sm:$0xf0] }
  0x7d   : > { %1474 = vmatmul.bf16.gmra.mxu1 %v2443_v30  ;;  %v2512_v20 = vld [vmem:[%s3193_s13 + $0x114] sm:$0xf0] }
  0x7e   : > { %1643 = vmatmul.bf16.gmra.mxu2 %v2447_v31 }
  0x8c   : > { %1310 = vmatmul.bf16.gmra.mxu0 %v2451_v40  ;;  %1430 = vmatmul.bf16.gmra.mxu3 %v2739_v41 }
  0x8d   : > { %1479 = vmatmul.bf16.gmra.mxu1 %v2455_v42 }
  0x8e   : > { %1648 = vmatmul.bf16.gmra.mxu2 %v2459_v43 }
  0x9c   : > { %1315 = vmatmul.bf16.gmra.mxu0 %v2463_v52  ;;  %1435 = vmatmul.bf16.gmra.mxu3 %v2751_v53  ;;  %v2506_v52 = vld [vmem:[%s3193_s13 + $0xf8] sm:$0xf]  ;;  %v2890_v53 = vld [vmem:[%s3193_s13 + $0x100] sm:$0xf0] }
  0x9d   : > { %1484 = vmatmul.bf16.gmra.mxu1 %v2467_v54  ;;  %v2507_v63 = vor.u32 %v2890_v53, %v2506_v52  ;;  %v2524_v52 = vld [vmem:[%s3193_s13 + $0x12c] sm:$0xf0]  ;;  %v2530_v53 = vld [vmem:[%s3193_s13 + $0x128] sm:$0xf] }
  0x9e   : > { %1653 = vmatmul.bf16.gmra.mxu2 %v2471_v55 }
  0xa9   : > { %v1281_v2 = vpop.f32.mrf.mxu0 }
  0xaa   : > { %v1450_v5 = vpop.f32.mrf.mxu1 }
  0xab   : > { %v1451_v6 = vadd.f32 %v1450_v5, %v1281_v2 }
  0xac   : > { %1320 = vmatmul.bf16.gmra.mxu0 %v2475_v0  ;;  %1569 = vmatmul.bf16.vlgmr.msrb.gmra.mxu3 %v2671_v1 }
  0xad   : > { %1489 = vmatmul.bf16.gmra.mxu1 %v2479_v3 }
  0xae   : > { %1658 = vmatmul.bf16.gmra.mxu2 %v2483_v4 }
  0xaf   : > { %v3301_v7 = vpop.f32.mrf.mxu3 }
  0xb1   : > { %v1619_v9 = vpop.f32.mrf.mxu2  ;;  %v1283_v12 = vpop.f32.mrf.mxu0 }
  0xb2   : > { %v1620_v10 = vadd.f32 %v1619_v9, %v1451_v6  ;;  %v1452_v13 = vpop.f32.mrf.mxu1 }
  0xb3   : > { %v1453_v23 = vadd.f32 %v1452_v13, %v1283_v12 }
  0xb4   : > { %v1978_v14 = vmul.f32 %v3306_v8, %v1620_v10 }
  0xb6   : > { %v2046_v17 = vadd.f32 %v3311_v11, %v1978_v14  ;;  %v2510_v14 = vld [vmem:[%s3193_s13 + $0x108] sm:$0xf] }
  0xb7   : > { %v3329_v26 = vpop.f32.mrf.mxu3 }
  0xb8   : > { %v2110_v25 = vmax.f32 %v2046_v17, 0.0  ;;  %v2891_v17 = vld [vmem:[%s3193_s13 + $0x10c] sm:$0xf] }
  0xb9   : > { %v1621_v27 = vpop.f32.mrf.mxu2  ;;  %v1286_v31 = vpop.f32.mrf.mxu0 }
  0xba   : > { %2174 = vst [vmem:[%s3324_s8] sm:$0xff] %v2110_v25  ;;  %v1622_v30 = vadd.f32 %v1621_v27, %v1453_v23  ;;  %v1455_v34 = vpop.f32.mrf.mxu1 }
  0xbb   : > { %v1456_v37 = vadd.f32 %v1455_v34, %v1286_v31 }
  0xbc   : > { %v1979_v35 = vmul.f32 %v3306_v8, %v1622_v30  ;;  %1325 = vmatmul.bf16.gmra.mxu0 %v2487_v28  ;;  %1574 = vmatmul.bf16.gmra.mxu3 %v2683_v29  ;;  %v2511_v28 = vor.u32 %v2892_v15, %v2510_v14  ;;  %v2707_v29 = vor.u32 %v2939_v18, %v2704_v19  ;;  %v2898_v18 = vld [vmem:[%s3193_s13 + $0x140] sm:$0xf0] }
  0xbd   : > { %1494 = vmatmul.bf16.gmra.mxu1 %v2491_v32  ;;  %v2515_v32 = vor.u32 %v2891_v17, %v2512_v20  ;;  %v2534_v17 = vld [vmem:[%s3193_s13 + $0x138] sm:$0xf]  ;;  %v2897_v20 = vld [vmem:[%s3193_s13 + $0x13c] sm:$0xf] }
  0xbe   : > { %v2047_v36 = vadd.f32 %v3311_v11, %v1979_v35  ;;  %1663 = vmatmul.bf16.gmra.mxu2 %v2495_v33  ;;  %v2519_v33 = vor.u32 %v2893_v22, %v2518_v21  ;;  %v2945_v21 = vld [vmem:[%s3193_s13 + $0x2bc] sm:$0xf]  ;;  %v2728_v22 = vld [vmem:[%s3193_s13 + $0x2c4] sm:$0xf0] }
  0xbf   : > { %v3334_v39 = vpop.f32.mrf.mxu3 }
  0xc0   : > { %v2111_v38 = vmax.f32 %v2047_v36, 0.0 }
  0xc1   : > { %v1624_v40 = vpop.f32.mrf.mxu2  ;;  %v1288_v42 = vpop.f32.mrf.mxu0 }
  0xc2   : > { %2175 = vst [vmem:[%s3324_s8 + $0x8] sm:$0xff] %v2111_v38  ;;  %v1625_v41 = vadd.f32 %v1624_v40, %v1456_v37  ;;  %v1457_v43 = vpop.f32.mrf.mxu1 }
  0xc3   : > { %v1458_v55 = vadd.f32 %v1457_v43, %v1288_v42 }
  0xc4   : > { %v1980_v44 = vmul.f32 %v3306_v8, %v1625_v41 }
  0xc6   : > { %v2048_v47 = vadd.f32 %v3311_v11, %v1980_v44 }
  0xc7   : > { %v3347_v56 = vpop.f32.mrf.mxu3 }
  0xc8   : > { %v2112_v54 = vmax.f32 %v2048_v47, 0.0  ;;  %v2895_v47 = vld [vmem:[%s3193_s13 + $0x128] sm:$0xf0] }
  0xc9   : > { %v1626_v57 = vpop.f32.mrf.mxu2  ;;  %v1291_v61 = vpop.f32.mrf.mxu0 }
  0xca   : > { %2176 = vst [vmem:[%s3324_s8 + $0x10] sm:$0xff] %v2112_v54  ;;  %v1627_v60 = vadd.f32 %v1626_v57, %v1458_v55  ;;  %v1460_v0 = vpop.f32.mrf.mxu1  ;;  %v2896_v54 = vld [vmem:[%s3193_s13 + $0x130] sm:$0xf0] }
  0xcb   : > { %v1461_v3 = vadd.f32 %v1460_v0, %v1291_v61  ;;  %v2719_v61 = vor.u32 %v2942_v50, %v2716_v51  ;;  %v2527_v0 = vor.u32 %v2894_v49, %v2524_v52  ;;  %v2546_v51 = vld [vmem:[%s3193_s13 + $0x150] sm:$0xf]  ;;  %v2901_v52 = vld [vmem:[%s3193_s13 + $0x158] sm:$0xf0] }
  0xcc   : > { %v1981_v1 = vmul.f32 %v3306_v8, %v1627_v60  ;;  %1330 = vmatmul.bf16.gmra.mxu0 %v2499_v58  ;;  %1579 = vmatmul.bf16.gmra.mxu3 %v2695_v59  ;;  %v2523_v60 = vor.u32 %v2895_v47, %v2522_v46 }
  0xcd   : > { %1499 = vmatmul.bf16.gmra.mxu1 %v2503_v62 }
  0xce   : > { %v2049_v2 = vadd.f32 %v3311_v11, %v1981_v1  ;;  %1668 = vmatmul.bf16.gmra.mxu2 %v2507_v63  ;;  %v2531_v1 = vor.u32 %v2896_v54, %v2530_v53  ;;  %v2900_v54 = vld [vmem:[%s3193_s13 + $0x154] sm:$0xf] }
  0xcf   : > { %v3352_v5 = vpop.f32.mrf.mxu3 }
  0xd0   : > { %v2113_v4 = vmax.f32 %v2049_v2, 0.0 }
  0xd1   : > { %v1629_v6 = vpop.f32.mrf.mxu2  ;;  %v1293_v10 = vpop.f32.mrf.mxu0 }
  0xd2   : > { %2177 = vst [vmem:[%s3324_s8 + $0x18] sm:$0xff] %v2113_v4  ;;  %v1630_v9 = vadd.f32 %v1629_v6, %v1461_v3  ;;  %v1462_v12 = vpop.f32.mrf.mxu1 }
  0xd3   : > { %v1463_v25 = vadd.f32 %v1462_v12, %v1293_v10 }
  0xd4   : > { %v1982_v13 = vmul.f32 %v3306_v8, %v1630_v9 }
  0xd6   : > { %v2050_v16 = vadd.f32 %v3311_v11, %v1982_v13 }
  0xd7   : > { %v3365_v23 = vpop.f32.mrf.mxu3 }
  0xd8   : > { %v2114_v24 = vmax.f32 %v2050_v16, 0.0 }
  0xd9   : > { %v1631_v27 = vpop.f32.mrf.mxu2  ;;  %v1296_v31 = vpop.f32.mrf.mxu0 }
  0xda   : > { %2178 = vst [vmem:[%s3324_s8 + $0x20] sm:$0xff] %v2114_v24  ;;  %v1632_v30 = vadd.f32 %v1631_v27, %v1463_v25  ;;  %v1465_v34 = vpop.f32.mrf.mxu1  ;;  %v2536_v24 = vld [vmem:[%s3193_s13 + $0x144] sm:$0xf0]  ;;  %v2542_v25 = vld [vmem:[%s3193_s13 + $0x140] sm:$0xf] }
  0xdb   : > { %v1466_v37 = vadd.f32 %v1465_v34, %v1296_v31  ;;  %v2899_v27 = vld [vmem:[%s3193_s13 + $0x148] sm:$0xf0] }
  0xdc   : > { %v1983_v35 = vmul.f32 %v3306_v8, %v1632_v30  ;;  %1335 = vmatmul.bf16.gmra.mxu0 %v2511_v28  ;;  %1584 = vmatmul.bf16.gmra.mxu3 %v2707_v29 }
  0xdd   : > { %1504 = vmatmul.bf16.gmra.mxu1 %v2515_v32  ;;  %v2535_v32 = vor.u32 %v2898_v18, %v2534_v17 }
  0xde   : > { %v2051_v36 = vadd.f32 %v3311_v11, %v1983_v35  ;;  %1673 = vmatmul.bf16.gmra.mxu2 %v2519_v33  ;;  %v2731_v33 = vor.u32 %v2945_v21, %v2728_v22 }
  0xdf   : > { %v3370_v40 = vpop.f32.mrf.mxu3 }
  0xe0   : > { %v2115_v38 = vmax.f32 %v2051_v36, 0.0  ;;  %v2539_v36 = vor.u32 %v2897_v20, %v2536_v24 }
  0xe1   : > { %v1634_v41 = vpop.f32.mrf.mxu2  ;;  %v1298_v43 = vpop.f32.mrf.mxu0 }
  0xe2   : > { %2179 = vst [vmem:[%s3324_s8 + $0x28] sm:$0xff] %v2115_v38  ;;  %v1635_v42 = vadd.f32 %v1634_v41, %v1466_v37  ;;  %v1467_v44 = vpop.f32.mrf.mxu1  ;;  %v2543_v37 = vor.u32 %v2899_v27, %v2542_v25  ;;  %v2558_v25 = vld [vmem:[%s3193_s13 + $0x168] sm:$0xf]  ;;  %v2904_v27 = vld [vmem:[%s3193_s13 + $0x170] sm:$0xf0] }
  0xe3   : > { %v1468_v57 = vadd.f32 %v1467_v44, %v1298_v43 }
  0xe4   : > { %v1984_v45 = vmul.f32 %v3306_v8, %v1635_v42 }
  0xe6   : > { %v2052_v48 = vadd.f32 %v3311_v11, %v1984_v45 }
  0xe7   : > { %v3383_v58 = vpop.f32.mrf.mxu3 }
  0xe8   : > { %v2116_v55 = vmax.f32 %v2052_v48, 0.0 }
  0xe9   : > { %v1636_v59 = vpop.f32.mrf.mxu2  ;;  %v1301_v63 = vpop.f32.mrf.mxu0 }
  0xea   : > { %2180 = vst [vmem:[%s3324_s8 + $0x30] sm:$0xff] %v2116_v55  ;;  %v1637_v62 = vadd.f32 %v1636_v59, %v1468_v57  ;;  %v1470_v2 = vpop.f32.mrf.mxu1  ;;  %v2948_v55 = vld [vmem:[%s3193_s13 + $0x2d4] sm:$0xf]  ;;  %v2740_v57 = vld [vmem:[%s3193_s13 + $0x2dc] sm:$0xf0] }
  0xeb   : > { %v1471_v6 = vadd.f32 %v1470_v2, %v1301_v63  ;;  %v2548_v59 = vld [vmem:[%s3193_s13 + $0x15c] sm:$0xf0]  ;;  %v2547_v2 = vor.u32 %v2901_v52, %v2546_v51 }
  0xec   : > { %v1985_v3 = vmul.f32 %v3306_v8, %v1637_v62  ;;  %1340 = vmatmul.bf16.gmra.mxu0 %v2523_v60  ;;  %1589 = vmatmul.bf16.gmra.mxu3 %v2719_v61  ;;  %v2554_v60 = vld [vmem:[%s3193_s13 + $0x158] sm:$0xf]  ;;  %v2902_v61 = vld [vmem:[%s3193_s13 + $0x160] sm:$0xf0] }
  0xed   : > { %1509 = vmatmul.bf16.gmra.mxu1 %v2527_v0 }
  0xee   : > { %v2053_v4 = vadd.f32 %v3311_v11, %v1985_v3  ;;  %1678 = vmatmul.bf16.gmra.mxu2 %v2531_v1  ;;  %v2743_v3 = vor.u32 %v2948_v55, %v2740_v57 }
  0xef   : > { %v3388_v10 = vpop.f32.mrf.mxu3 }
  0xf0   : > { %v2117_v9 = vmax.f32 %v2053_v4, 0.0 }
  0xf1   : > { %v1639_v12 = vpop.f32.mrf.mxu2  ;;  %v1303_v14 = vpop.f32.mrf.mxu0 }
  0xf2   : > { %2181 = vst [vmem:[%s3324_s8 + $0x38] sm:$0xff] %v2117_v9  ;;  %v1640_v13 = vadd.f32 %v1639_v12, %v1471_v6  ;;  %v1472_v15 = vpop.f32.mrf.mxu1  ;;  %v2551_v9 = vor.u32 %v2900_v54, %v2548_v59  ;;  %v2555_v12 = vor.u32 %v2902_v61, %v2554_v60 }
  0xf3   : > { %v1473_v29 = vadd.f32 %v1472_v15, %v1303_v14 }
  0xf4   : > { %v1986_v16 = vmul.f32 %v3306_v8, %v1640_v13 }
  0xf6   : > { %v2054_v19 = vadd.f32 %v3311_v11, %v1986_v16 }
  0xf7   : > { %v3401_v30 = vpop.f32.mrf.mxu3 }
  0xf8   : > { %v2118_v28 = vmax.f32 %v2054_v19, 0.0 }
  0xf9   : > { %v1641_v31 = vpop.f32.mrf.mxu2  ;;  %v1306_v35 = vpop.f32.mrf.mxu0 }
  0xfa   : > { %2182 = vst [vmem:[%s3324_s8 + $0x40] sm:$0xff] %v2118_v28  ;;  %v1642_v34 = vadd.f32 %v1641_v31, %v1473_v29  ;;  %v1475_v38 = vpop.f32.mrf.mxu1  ;;  %v2903_v29 = vld [vmem:[%s3193_s13 + $0x16c] sm:$0xf] }
  0xfb   : > { %v1476_v43 = vadd.f32 %v1475_v38, %v1306_v35  ;;  %v2951_v31 = vld [vmem:[%s3193_s13 + $0x2ec] sm:$0xf]  ;;  %v2905_v35 = vld [vmem:[%s3193_s13 + $0x178] sm:$0xf0] }
  0xfc   : > { %v1987_v41 = vmul.f32 %v3306_v8, %v1642_v34  ;;  %1345 = vmatmul.bf16.gmra.mxu0 %v2535_v32  ;;  %1594 = vmatmul.bf16.gmra.mxu3 %v2731_v33  ;;  %v2752_v32 = vld [vmem:[%s3193_s13 + $0x2f4] sm:$0xf0]  ;;  %v2566_v34 = vld [vmem:[%s3193_s13 + $0x170] sm:$0xf] }
  0xfd   : > { %1514 = vmatmul.bf16.gmra.mxu1 %v2539_v36  ;;  %v2560_v33 = vld [vmem:[%s3193_s13 + $0x174] sm:$0xf0] }
  0xfe   : > { %v2055_v42 = vadd.f32 %v3311_v11, %v1987_v41  ;;  %1683 = vmatmul.bf16.gmra.mxu2 %v2543_v37 }
  0xff   : > { %v3406_v45 = vpop.f32.mrf.mxu3 }
 0x100   : > { %v2119_v44 = vmax.f32 %v2055_v42, 0.0  ;;  %v2559_v42 = vor.u32 %v2904_v27, %v2558_v25 }
 0x101   : > { %v1644_v46 = vpop.f32.mrf.mxu2  ;;  %v1308_v48 = vpop.f32.mrf.mxu0 }
 0x102   : > { %2183 = vst [vmem:[%s3324_s8 + $0x48] sm:$0xff] %v2119_v44  ;;  %v1645_v47 = vadd.f32 %v1644_v46, %v1476_v43  ;;  %v1477_v49 = vpop.f32.mrf.mxu1  ;;  %v2755_v43 = vor.u32 %v2951_v31, %v2752_v32 }
 0x103   : > { %v1478_v63 = vadd.f32 %v1477_v49, %v1308_v48  ;;  %v2567_v48 = vor.u32 %v2905_v35, %v2566_v34 }
 0x104   : > { %v1988_v50 = vmul.f32 %v3306_v8, %v1645_v47  ;;  %v2563_v47 = vor.u32 %v2903_v29, %v2560_v33 }
 0x106   : > { %v2056_v53 = vadd.f32 %v3311_v11, %v1988_v50 }
 0x107   : > { %v3419_v0 = vpop.f32.mrf.mxu3 }
 0x108   : > { %v2120_v62 = vmax.f32 %v2056_v53, 0.0 }
 0x109   : > { %v1646_v1 = vpop.f32.mrf.mxu2  ;;  %v1311_v6 = vpop.f32.mrf.mxu0 }
 0x10a   : > { %2184 = vst [vmem:[%s3324_s8 + $0x50] sm:$0xff] %v2120_v62  ;;  %v1647_v4 = vadd.f32 %v1646_v1, %v1478_v63  ;;  %v1480_v13 = vpop.f32.mrf.mxu1  ;;  %v2570_v62 = vld [vmem:[%s3193_s13 + $0x180] sm:$0xf]  ;;  %v2907_v63 = vld [vmem:[%s3193_s13 + $0x188] sm:$0xf0] }
 0x10b   : > { %v1481_v16 = vadd.f32 %v1480_v13, %v1311_v6  ;;  %v2572_v6 = vld [vmem:[%s3193_s13 + $0x18c] sm:$0xf0] }
 0x10c   : > { %v1989_v14 = vmul.f32 %v3306_v8, %v1647_v4  ;;  %1350 = vmatmul.bf16.gmra.mxu0 %v2547_v2  ;;  %1599 = vmatmul.bf16.gmra.mxu3 %v2743_v3  ;;  %v2906_v2 = vld [vmem:[%s3193_s13 + $0x184] sm:$0xf]  ;;  %v2674_v3 = vld [vmem:[%s3193_s13 + $0x248] sm:$0xf]  ;;  %v2932_v4 = vld [vmem:[%s3193_s13 + $0x250] sm:$0xf0] }
 0x10d   : > { %1519 = vmatmul.bf16.gmra.mxu1 %v2551_v9  ;;  %v2578_v9 = vld [vmem:[%s3193_s13 + $0x188] sm:$0xf] }
 0x10e   : > { %v2057_v15 = vadd.f32 %v3311_v11, %v1989_v14  ;;  %1688 = vmatmul.bf16.gmra.mxu2 %v2555_v12  ;;  %v2908_v12 = vld [vmem:[%s3193_s13 + $0x190] sm:$0xf0] }
 0x10f   : > { %v3424_v18 = vpop.f32.mrf.mxu3 }
 0x110   : > { %v2121_v17 = vmax.f32 %v2057_v15, 0.0 }
 0x111   : > { %v1649_v19 = vpop.f32.mrf.mxu2  ;;  %v1313_v21 = vpop.f32.mrf.mxu0 }
 0x112   : > { %2185 = vst [vmem:[%s3324_s8 + $0x58] sm:$0xff] %v2121_v17  ;;  %v1650_v20 = vadd.f32 %v1649_v19, %v1481_v16  ;;  %v1482_v22 = vpop.f32.mrf.mxu1  ;;  %v2571_v17 = vor.u32 %v2907_v63, %v2570_v62  ;;  %v2675_v19 = vor.u32 %v2932_v4, %v2674_v3 }
 0x113   : > { %v1483_v37 = vadd.f32 %v1482_v22, %v1313_v21  ;;  %v2575_v22 = vor.u32 %v2906_v2, %v2572_v6 }
 0x114   : > { %v1990_v24 = vmul.f32 %v3306_v8, %v1650_v20 }
 0x116   : > { %v2058_v28 = vadd.f32 %v3311_v11, %v1990_v24  ;;  %v2579_v24 = vor.u32 %v2908_v12, %v2578_v9 }
 0x117   : > { %v3437_v38 = vpop.f32.mrf.mxu3 }
 0x118   : > { %v2122_v36 = vmax.f32 %v2058_v28, 0.0 }
 0x119   : > { %v1651_v41 = vpop.f32.mrf.mxu2  ;;  %v1316_v46 = vpop.f32.mrf.mxu0 }
 0x11a   : > { %2186 = vst [vmem:[%s3324_s8 + $0x60] sm:$0xff] %v2122_v36  ;;  %v1652_v44 = vadd.f32 %v1651_v41, %v1483_v37  ;;  %v1485_v49 = vpop.f32.mrf.mxu1  ;;  %v2582_v41 = vld [vmem:[%s3193_s13 + $0x198] sm:$0xf] }
 0x11b   : > { %v1486_v52 = vadd.f32 %v1485_v49, %v1316_v46  ;;  %v2686_v46 = vld [vmem:[%s3193_s13 + $0x260] sm:$0xf] }
 0x11c   : > { %v1991_v50 = vmul.f32 %v3306_v8, %v1652_v44  ;;  %1355 = vmatmul.bf16.gmra.mxu0 %v2559_v42  ;;  %1604 = vmatmul.bf16.gmra.mxu3 %v2755_v43  ;;  %v2910_v42 = vld [vmem:[%s3193_s13 + $0x1a0] sm:$0xf0]  ;;  %v2909_v44 = vld [vmem:[%s3193_s13 + $0x19c] sm:$0xf]  ;;  %v2590_v49 = vld [vmem:[%s3193_s13 + $0x1a0] sm:$0xf] }
 0x11d   : > { %1524 = vmatmul.bf16.gmra.mxu1 %v2563_v47  ;;  %v2935_v47 = vld [vmem:[%s3193_s13 + $0x268] sm:$0xf0] }
 0x11e   : > { %v2059_v51 = vadd.f32 %v3311_v11, %v1991_v50  ;;  %1693 = vmatmul.bf16.gmra.mxu2 %v2567_v48  ;;  %v2584_v48 = vld [vmem:[%s3193_s13 + $0x1a4] sm:$0xf0]  ;;  %v2911_v50 = vld [vmem:[%s3193_s13 + $0x1a8] sm:$0xf0] }
 0x11f   : > { %v3442_v54 = vpop.f32.mrf.mxu3  ;;  %v2587_v62 = vor.u32 %v2909_v44, %v2584_v48  ;;  %v2591_v63 = vor.u32 %v2911_v50, %v2590_v49 }
 0x120   : > { %v2123_v53 = vmax.f32 %v2059_v51, 0.0 }
 0x121   : > { %v1654_v55 = vpop.f32.mrf.mxu2  ;;  %v1318_v59 = vpop.f32.mrf.mxu0 }
 0x122   : > { %2187 = vst [vmem:[%s3324_s8 + $0x68] sm:$0xff] %v2123_v53  ;;  %v1655_v57 = vadd.f32 %v1654_v55, %v1486_v52  ;;  %v1487_v60 = vpop.f32.mrf.mxu1 }
 0x123   : > { %v1488_v14 = vadd.f32 %v1487_v60, %v1318_v59  ;;  %v2687_v59 = vor.u32 %v2935_v47, %v2686_v46 }
 0x124   : > { %v1992_v61 = vmul.f32 %v3306_v8, %v1655_v57  ;;  %v2583_v57 = vor.u32 %v2910_v42, %v2582_v41 }
 0x126   : > { %v2060_v1 = vadd.f32 %v3311_v11, %v1992_v61 }
 0x127   : > { %v3455_v15 = vpop.f32.mrf.mxu3 }
 0x128   : > { %v2124_v13 = vmax.f32 %v2060_v1, 0.0 }
 0x129   : > { %v1656_v16 = vpop.f32.mrf.mxu2  ;;  %v1321_v21 = vpop.f32.mrf.mxu0 }
 0x12a   : > { %2188 = vst [vmem:[%s3324_s8 + $0x70] sm:$0xff] %v2124_v13  ;;  %v1657_v20 = vadd.f32 %v1656_v16, %v1488_v14  ;;  %v1490_v25 = vpop.f32.mrf.mxu1 }
 0x12b   : > { %v1491_v29 = vadd.f32 %v1490_v25, %v1321_v21  ;;  %v2938_v25 = vld [vmem:[%s3193_s13 + $0x280] sm:$0xf0] }
 0x12c   : > { %v1993_v27 = vmul.f32 %v3306_v8, %v1657_v20  ;;  %1360 = vmatmul.bf16.gmra.mxu0 %v2571_v17  ;;  %1738 = vmatmul.bf16.vlgmr.msra.gmra.mxu3 %v2675_v19  ;;  %v2594_v19 = vld [vmem:[%s3193_s13 + $0x1b0] sm:$0xf]  ;;  %v2913_v20 = vld [vmem:[%s3193_s13 + $0x1b8] sm:$0xf0] }
 0x12d   : > { %1529 = vmatmul.bf16.gmra.mxu1 %v2575_v22  ;;  %v2912_v22 = vld [vmem:[%s3193_s13 + $0x1b4] sm:$0xf] }
 0x12e   : > { %v2061_v28 = vadd.f32 %v3311_v11, %v1993_v27  ;;  %1698 = vmatmul.bf16.gmra.mxu2 %v2579_v24  ;;  %v2698_v24 = vld [vmem:[%s3193_s13 + $0x278] sm:$0xf]  ;;  %v2596_v27 = vld [vmem:[%s3193_s13 + $0x1bc] sm:$0xf0] }
 0x12f   : > { %v3460_v32 = vpop.f32.mrf.mxu3 }
 0x130   : > { %v2125_v31 = vmax.f32 %v2061_v28, 0.0  ;;  %v2602_v28 = vld [vmem:[%s3193_s13 + $0x1b8] sm:$0xf] }
 0x131   : > { %v1659_v33 = vpop.f32.mrf.mxu2  ;;  %v1323_v35 = vpop.f32.mrf.mxu0 }
 0x132   : > { %2189 = vst [vmem:[%s3324_s8 + $0x78] sm:$0xff] %v2125_v31  ;;  %v1660_v34 = vadd.f32 %v1659_v33, %v1491_v29  ;;  %v1492_v36 = vpop.f32.mrf.mxu1  ;;  %v2914_v29 = vld [vmem:[%s3193_s13 + $0x1c0] sm:$0xf0] }
 0x133   : > { %v1493_v52 = vadd.f32 %v1492_v36, %v1323_v35  ;;  %v2595_v36 = vor.u32 %v2913_v20, %v2594_v19  ;;  %v2603_v44 = vor.u32 %v2914_v29, %v2602_v28 }
 0x134   : > { %v1994_v37 = vmul.f32 %v3306_v8, %v1660_v34 }
 0x136   : > { %v2062_v43 = vadd.f32 %v3311_v11, %v1994_v37  ;;  %v2699_v37 = vor.u32 %v2938_v25, %v2698_v24 }
 0x137   : > { %v3473_v53 = vpop.f32.mrf.mxu3 }
 0x138   : > { %v2126_v51 = vmax.f32 %v2062_v43, 0.0  ;;  %v2599_v43 = vor.u32 %v2912_v22, %v2596_v27 }
 0x139   : > { %v1661_v55 = vpop.f32.mrf.mxu2  ;;  %v1326_v61 = vpop.f32.mrf.mxu0 }
 0x13a   : > { %2190 = vst [vmem:[%s3324_s8 + $0x80] sm:$0xff] %v2126_v51  ;;  %v1662_v60 = vadd.f32 %v1661_v55, %v1493_v52  ;;  %v1495_v1 = vpop.f32.mrf.mxu1 }
 0x13b   : > { %v1496_v4 = vadd.f32 %v1495_v1, %v1326_v61  ;;  %v2606_v61 = vld [vmem:[%s3193_s13 + $0x1c8] sm:$0xf]  ;;  %v2915_v1 = vld [vmem:[%s3193_s13 + $0x1cc] sm:$0xf] }
 0x13c   : > { %v1995_v2 = vmul.f32 %v3306_v8, %v1662_v60  ;;  %1365 = vmatmul.bf16.gmra.mxu0 %v2583_v57  ;;  %1743 = vmatmul.bf16.gmra.mxu3 %v2687_v59 }
 0x13d   : > { %1534 = vmatmul.bf16.gmra.mxu1 %v2587_v62  ;;  %v2916_v62 = vld [vmem:[%s3193_s13 + $0x1d0] sm:$0xf0] }
 0x13e   : > { %v2063_v3 = vadd.f32 %v3311_v11, %v1995_v2  ;;  %1703 = vmatmul.bf16.gmra.mxu2 %v2591_v63  ;;  %v2710_v2 = vld [vmem:[%s3193_s13 + $0x290] sm:$0xf]  ;;  %v2607_v19 = vor.u32 %v2916_v62, %v2606_v61 }
 0x13f   : > { %v3478_v9 = vpop.f32.mrf.mxu3 }
 0x140   : > { %v2127_v6 = vmax.f32 %v2063_v3, 0.0  ;;  %v2941_v3 = vld [vmem:[%s3193_s13 + $0x298] sm:$0xf0] }
 0x141   : > { %v1664_v12 = vpop.f32.mrf.mxu2  ;;  %v1328_v14 = vpop.f32.mrf.mxu0  ;;  %v2711_v20 = vor.u32 %v2941_v3, %v2710_v2 }
 0x142   : > { %2191 = vst [vmem:[%s3324_s8 + $0x88] sm:$0xff] %v2127_v6  ;;  %v1665_v13 = vadd.f32 %v1664_v12, %v1496_v4  ;;  %v1497_v16 = vpop.f32.mrf.mxu1  ;;  %v2608_v4 = vld [vmem:[%s3193_s13 + $0x1d4] sm:$0xf0]  ;;  %v2614_v6 = vld [vmem:[%s3193_s13 + $0x1d0] sm:$0xf] }
 0x143   : > { %v1498_v33 = vadd.f32 %v1497_v16, %v1328_v14  ;;  %v2917_v12 = vld [vmem:[%s3193_s13 + $0x1d8] sm:$0xf0]  ;;  %v2611_v24 = vor.u32 %v2915_v1, %v2608_v4 }
 0x144   : > { %v1996_v17 = vmul.f32 %v3306_v8, %v1665_v13  ;;  %v2615_v25 = vor.u32 %v2917_v12, %v2614_v6 }
 0x146   : > { %v2064_v21 = vadd.f32 %v3311_v11, %v1996_v17 }
 0x147   : > { %v3491_v34 = vpop.f32.mrf.mxu3 }
 0x148   : > { %v2128_v31 = vmax.f32 %v2064_v21, 0.0 }
 0x149   : > { %v1666_v35 = vpop.f32.mrf.mxu2  ;;  %v1331_v42 = vpop.f32.mrf.mxu0 }
 0x14a   : > { %2192 = vst [vmem:[%s3324_s8 + $0x90] sm:$0xff] %v2128_v31  ;;  %v1667_v41 = vadd.f32 %v1666_v35, %v1498_v33  ;;  %v1500_v46 = vpop.f32.mrf.mxu1 }
 0x14b   : > { %v1501_v49 = vadd.f32 %v1500_v46, %v1331_v42  ;;  %v2919_v46 = vld [vmem:[%s3193_s13 + $0x1e8] sm:$0xf0] }
 0x14c   : > { %v1997_v47 = vmul.f32 %v3306_v8, %v1667_v41  ;;  %1370 = vmatmul.bf16.gmra.mxu0 %v2595_v36  ;;  %1748 = vmatmul.bf16.gmra.mxu3 %v2699_v37 }
 0x14d   : > { %1539 = vmatmul.bf16.gmra.mxu1 %v2599_v43 }
 0x14e   : > { %v2065_v48 = vadd.f32 %v3311_v11, %v1997_v47  ;;  %1708 = vmatmul.bf16.gmra.mxu2 %v2603_v44  ;;  %v2618_v44 = vld [vmem:[%s3193_s13 + $0x1e0] sm:$0xf] }
 0x14f   : > { %v3496_v51 = vpop.f32.mrf.mxu3 }
 0x150   : > { %v2129_v50 = vmax.f32 %v2065_v48, 0.0  ;;  %v2918_v48 = vld [vmem:[%s3193_s13 + $0x1e4] sm:$0xf] }
 0x151   : > { %v1669_v52 = vpop.f32.mrf.mxu2  ;;  %v1333_v57 = vpop.f32.mrf.mxu0 }
 0x152   : > { %2193 = vst [vmem:[%s3324_s8 + $0x98] sm:$0xff] %v2129_v50  ;;  %v1670_v55 = vadd.f32 %v1669_v52, %v1501_v49  ;;  %v1502_v59 = vpop.f32.mrf.mxu1  ;;  %v2722_v49 = vld [vmem:[%s3193_s13 + $0x2a8] sm:$0xf]  ;;  %v2944_v50 = vld [vmem:[%s3193_s13 + $0x2b0] sm:$0xf0] }
 0x153   : > { %v1503_v14 = vadd.f32 %v1502_v59, %v1333_v57  ;;  %v2620_v52 = vld [vmem:[%s3193_s13 + $0x1ec] sm:$0xf0]  ;;  %v2920_v57 = vld [vmem:[%s3193_s13 + $0x1f0] sm:$0xf0]  ;;  %v2723_v1 = vor.u32 %v2944_v50, %v2722_v49 }
 0x154   : > { %v1998_v60 = vmul.f32 %v3306_v8, %v1670_v55  ;;  %v2626_v55 = vld [vmem:[%s3193_s13 + $0x1e8] sm:$0xf]  ;;  %v2623_v4 = vor.u32 %v2918_v48, %v2620_v52 }
 0x155   : > { %v2627_v6 = vor.u32 %v2920_v57, %v2626_v55 }
 0x156   : > { %v2066_v63 = vadd.f32 %v3311_v11, %v1998_v60 }
 0x157   : > { %v3509_v16 = vpop.f32.mrf.mxu3 }
 0x158   : > { %v2130_v13 = vmax.f32 %v2066_v63, 0.0  ;;  %v2619_v63 = vor.u32 %v2919_v46, %v2618_v44 }
 0x159   : > { %v1671_v17 = vpop.f32.mrf.mxu2  ;;  %v1336_v22 = vpop.f32.mrf.mxu0 }
 0x15a   : > { %2194 = vst [vmem:[%s3324_s8 + $0xa0] sm:$0xff] %v2130_v13  ;;  %v1672_v21 = vadd.f32 %v1671_v17, %v1503_v14  ;;  %v1505_v27 = vpop.f32.mrf.mxu1 }
 0x15b   : > { %v1506_v31 = vadd.f32 %v1505_v27, %v1336_v22 }
 0x15c   : > { %v1999_v28 = vmul.f32 %v3306_v8, %v1672_v21  ;;  %1375 = vmatmul.bf16.gmra.mxu0 %v2607_v19  ;;  %1753 = vmatmul.bf16.gmra.mxu3 %v2711_v20 }
 0x15d   : > { %1544 = vmatmul.bf16.gmra.mxu1 %v2611_v24 }
 0x15e   : > { %v2067_v29 = vadd.f32 %v3311_v11, %v1999_v28  ;;  %1713 = vmatmul.bf16.gmra.mxu2 %v2615_v25  ;;  %v2630_v28 = vld [vmem:[%s3193_s13 + $0x1f8] sm:$0xf] }
 0x15f   : > { %v3514_v35 = vpop.f32.mrf.mxu3 }
 0x160   : > { %v2131_v33 = vmax.f32 %v2067_v29, 0.0  ;;  %v2922_v29 = vld [vmem:[%s3193_s13 + $0x200] sm:$0xf0] }
 0x161   : > { %v1674_v36 = vpop.f32.mrf.mxu2  ;;  %v1338_v41 = vpop.f32.mrf.mxu0  ;;  %v2631_v49 = vor.u32 %v2922_v29, %v2630_v28  ;;  %v2650_v28 = vld [vmem:[%s3193_s13 + $0x218] sm:$0xf]  ;;  %v2926_v29 = vld [vmem:[%s3193_s13 + $0x220] sm:$0xf0] }
 0x162   : > { %2195 = vst [vmem:[%s3324_s8 + $0xa8] sm:$0xff] %v2131_v33  ;;  %v1675_v37 = vadd.f32 %v1674_v36, %v1506_v31  ;;  %v1507_v42 = vpop.f32.mrf.mxu1  ;;  %v2921_v33 = vld [vmem:[%s3193_s13 + $0x1fc] sm:$0xf]  ;;  %v2734_v36 = vld [vmem:[%s3193_s13 + $0x2c0] sm:$0xf] }
 0x163   : > { %v1508_v60 = vadd.f32 %v1507_v42, %v1338_v41  ;;  %v2632_v41 = vld [vmem:[%s3193_s13 + $0x204] sm:$0xf0]  ;;  %v2638_v42 = vld [vmem:[%s3193_s13 + $0x200] sm:$0xf] }
 0x164   : > { %v2000_v43 = vmul.f32 %v3306_v8, %v1675_v37  ;;  %v2947_v37 = vld [vmem:[%s3193_s13 + $0x2c8] sm:$0xf0]  ;;  %v2635_v57 = vor.u32 %v2921_v33, %v2632_v41 }
 0x165   : > { %v2735_v50 = vor.u32 %v2947_v37, %v2734_v36 }
 0x166   : > { %v2068_v47 = vadd.f32 %v3311_v11, %v2000_v43  ;;  %v2923_v43 = vld [vmem:[%s3193_s13 + $0x208] sm:$0xf0] }
 0x167   : > { %v3527_v61 = vpop.f32.mrf.mxu3 }
 0x168   : > { %v2132_v59 = vmax.f32 %v2068_v47, 0.0 }
 0x169   : > { %v1676_v62 = vpop.f32.mrf.mxu2  ;;  %v1341_v3 = vpop.f32.mrf.mxu0 }
 0x16a   : > { %2196 = vst [vmem:[%s3324_s8 + $0xb0] sm:$0xff] %v2132_v59  ;;  %v1677_v2 = vadd.f32 %v1676_v62, %v1508_v60  ;;  %v1510_v12 = vpop.f32.mrf.mxu1  ;;  %v2639_v59 = vor.u32 %v2923_v43, %v2638_v42 }
 0x16b   : > { %v1511_v17 = vadd.f32 %v1510_v12, %v1341_v3 }
 0x16c   : > { %v2001_v13 = vmul.f32 %v3306_v8, %v1677_v2  ;;  %1380 = vmatmul.bf16.gmra.mxu0 %v2619_v63  ;;  %1758 = vmatmul.bf16.gmra.mxu3 %v2723_v1 }
 0x16d   : > { %1549 = vmatmul.bf16.gmra.mxu1 %v2623_v4 }
 0x16e   : > { %v2069_v14 = vadd.f32 %v3311_v11, %v2001_v13  ;;  %1718 = vmatmul.bf16.gmra.mxu2 %v2627_v6 }
 0x16f   : > { %v3532_v20 = vpop.f32.mrf.mxu3 }
 0x170   : > { %v2133_v19 = vmax.f32 %v2069_v14, 0.0 }
 0x171   : > { %v1679_v21 = vpop.f32.mrf.mxu2  ;;  %v1343_v24 = vpop.f32.mrf.mxu0 }
 0x172   : > { %2197 = vst [vmem:[%s3324_s8 + $0xb8] sm:$0xff] %v2133_v19  ;;  %v1680_v22 = vadd.f32 %v1679_v21, %v1511_v17  ;;  %v1512_v25 = vpop.f32.mrf.mxu1  ;;  %v2642_v17 = vld [vmem:[%s3193_s13 + $0x210] sm:$0xf]  ;;  %v2925_v19 = vld [vmem:[%s3193_s13 + $0x218] sm:$0xf0] }
 0x173   : > { %v1513_v46 = vadd.f32 %v1512_v25, %v1343_v24  ;;  %v2746_v24 = vld [vmem:[%s3193_s13 + $0x2d8] sm:$0xf]  ;;  %v2950_v25 = vld [vmem:[%s3193_s13 + $0x2e0] sm:$0xf0]  ;;  %v2643_v41 = vor.u32 %v2925_v19, %v2642_v17  ;;  %v2953_v17 = vld [vmem:[%s3193_s13 + $0x2f8] sm:$0xf0] }
 0x174   : > { %v2002_v27 = vmul.f32 %v3306_v8, %v1680_v22  ;;  %v2924_v22 = vld [vmem:[%s3193_s13 + $0x214] sm:$0xf]  ;;  %v2747_v42 = vor.u32 %v2950_v25, %v2746_v24  ;;  %v2656_v19 = vld [vmem:[%s3193_s13 + $0x234] sm:$0xf0] }
 0x176   : > { %v2070_v31 = vadd.f32 %v3311_v11, %v2002_v27  ;;  %v2644_v27 = vld [vmem:[%s3193_s13 + $0x21c] sm:$0xf0] }
 0x177   : > { %v3545_v47 = vpop.f32.mrf.mxu3 }
 0x178   : > { %v2134_v44 = vmax.f32 %v2070_v31, 0.0 }
 0x179   : > { %v1681_v48 = vpop.f32.mrf.mxu2  ;;  %v1346_v55 = vpop.f32.mrf.mxu0 }
 0x17a   : > { %2198 = vst [vmem:[%s3324_s8 + $0xc0] sm:$0xff] %v2134_v44  ;;  %v1682_v52 = vadd.f32 %v1681_v48, %v1513_v46  ;;  %v1515_v60 = vpop.f32.mrf.mxu1  ;;  %v2647_v46 = vor.u32 %v2924_v22, %v2644_v27  ;;  %v2651_v48 = vor.u32 %v2926_v29, %v2650_v28  ;;  %v2929_v22 = vld [vmem:[%s3193_s13 + $0x238] sm:$0xf0] }
 0x17b   : > { %v1516_v1 = vadd.f32 %v1515_v60, %v1346_v55 }
 0x17c   : > { %v2003_v62 = vmul.f32 %v3306_v8, %v1682_v52  ;;  %1385 = vmatmul.bf16.gmra.mxu0 %v2631_v49  ;;  %1763 = vmatmul.bf16.gmra.mxu3 %v2735_v50 }
 0x17d   : > { %1554 = vmatmul.bf16.gmra.mxu1 %v2635_v57 }
 0x17e   : > { %v2071_v63 = vadd.f32 %v3311_v11, %v2003_v62  ;;  %1723 = vmatmul.bf16.gmra.mxu2 %v2639_v59 }
 0x17f   : > { %v3550_v3 = vpop.f32.mrf.mxu3 }
 0x180   : > { %v2135_v2 = vmax.f32 %v2071_v63, 0.0 }
 0x181   : > { %v1684_v4 = vpop.f32.mrf.mxu2  ;;  %v1348_v12 = vpop.f32.mrf.mxu0 }
 0x182   : > { %2199 = vst [vmem:[%s3324_s8 + $0xc8] sm:$0xff] %v2135_v2  ;;  %v1685_v6 = vadd.f32 %v1684_v4, %v1516_v1  ;;  %v1517_v13 = vpop.f32.mrf.mxu1  ;;  %v2654_v2 = vld [vmem:[%s3193_s13 + $0x228] sm:$0xf]  ;;  %v2928_v4 = vld [vmem:[%s3193_s13 + $0x230] sm:$0xf0] }
 0x183   : > { %v1518_v33 = vadd.f32 %v1517_v13, %v1348_v12  ;;  %v2927_v13 = vld [vmem:[%s3193_s13 + $0x22c] sm:$0xf]  ;;  %v2655_v29 = vor.u32 %v2928_v4, %v2654_v2 }
 0x184   : > { %v2004_v14 = vmul.f32 %v3306_v8, %v1685_v6  ;;  %v3582_v6 = vld [vmem:[%s3747_s3] ss:$0 sm:$0xff] }
 0x186   : > { %v2072_v21 = vadd.f32 %v3311_v11, %v2004_v14  ;;  %v2758_v14 = vld [vmem:[%s3193_s13 + $0x2f0] sm:$0xf] }
 0x187   : > { %v3563_v36 = vpop.f32.mrf.mxu3 }
 0x188   : > { %v2136_v31 = vmax.f32 %v2072_v21, 0.0  ;;  %v2662_v21 = vld [vmem:[%s3193_s13 + $0x230] sm:$0xf] }
 0x189   : > { %v1686_v37 = vpop.f32.mrf.mxu2  ;;  %v1351_v44 = vpop.f32.mrf.mxu0 }
 0x18a   : > { %2200 = vst [vmem:[%s3324_s8 + $0xd0] sm:$0xff] %v2136_v31  ;;  %v1687_v43 = vadd.f32 %v1686_v37, %v1518_v33  ;;  %v1520_v49 = vpop.f32.mrf.mxu1  ;;  %v2759_v31 = vor.u32 %v2953_v17, %v2758_v14 }
 0x18b   : > { %v1521_v55 = vadd.f32 %v1520_v49, %v1351_v44 }
 0x18c   : > { %v2005_v50 = vmul.f32 %v3306_v8, %v1687_v43  ;;  %1390 = vmatmul.bf16.gmra.mxu0 %v2643_v41  ;;  %1768 = vmatmul.bf16.gmra.mxu3 %v2747_v42  ;;  %v2659_v41 = vor.u32 %v2927_v13, %v2656_v19  ;;  %v2663_v42 = vor.u32 %v2929_v22, %v2662_v21 }
 0x18d   : > { %1559 = vmatmul.bf16.gmra.mxu1 %v2647_v46  ;;  %v1571_v22 = vadd.f32 %v3460_v32, %v3301_v7  ;;  %v1573_v7 = vadd.f32 %v3473_v53, %v3329_v26 }
 0x18e   : > { %v2073_v52 = vadd.f32 %v3311_v11, %v2005_v50  ;;  %1728 = vmatmul.bf16.gmra.mxu2 %v2651_v48  ;;  %v3574_v11 = vld [vmem:[%s3746_s2] ss:$0 sm:$0xff] }
 0x18f   : > { %v3568_v59 = vpop.f32.mrf.mxu3 }
 0x190   : > { %v2137_v57 = vmax.f32 %v2073_v52, 0.0 }
 0x191   : > { %v1689_v60 = vpop.f32.mrf.mxu2  ;;  %v1353_v62 = vpop.f32.mrf.mxu0 }
 0x192   : > { %2201 = vst [vmem:[%s3324_s8 + $0xd8] sm:$0xff] %v2137_v57  ;;  %v1690_v8 = vadd.f32 %v1689_v60, %v1521_v55  ;;  %v1522_v63 = vpop.f32.mrf.mxu1 }
 0x193   : > { %v1523_v25 = vadd.f32 %v1522_v63, %v1353_v62 }
 0x194   : > { %v2006_v1 = vmul.f32 %v3574_v11, %v1690_v8 }
 0x196   : > { %v2074_v12 = vadd.f32 %v3582_v6, %v2006_v1 }
 0x197   : > { %v3591_v27 = vpop.f32.mrf.mxu3 }
 0x198   : > { %v2138_v24 = vmax.f32 %v2074_v12, 0.0 }
 0x199   : > { %v1691_v28 = vpop.f32.mrf.mxu2  ;;  %v1356_v37 = vpop.f32.mrf.mxu0 }
 0x19a   : > { %2202 = vst [vmem:[%s3324_s8 + $0xe0] sm:$0xff] %v2138_v24  ;;  %v1692_v33 = vadd.f32 %v1691_v28, %v1523_v25  ;;  %v1525_v43 = vpop.f32.mrf.mxu1 }
 0x19b   : > { %v1526_v48 = vadd.f32 %v1525_v43, %v1356_v37 }
 0x19c   : > { %v2007_v44 = vmul.f32 %v3574_v11, %v1692_v33  ;;  %1395 = vmatmul.bf16.gmra.mxu0 %v2655_v29  ;;  %1773 = vmatmul.bf16.gmra.mxu3 %v2759_v31 }
 0x19d   : > { %1564 = vmatmul.bf16.gmra.mxu1 %v2659_v41 }
 0x19e   : > { %v2075_v46 = vadd.f32 %v3582_v6, %v2007_v44  ;;  %1733 = vmatmul.bf16.gmra.mxu2 %v2663_v42 }
 0x19f   : > { %v3596_v50 = vpop.f32.mrf.mxu3 }
 0x1a0   : > { %v2139_v49 = vmax.f32 %v2075_v46, 0.0 }
 0x1a1   : > { %v1694_v52 = vpop.f32.mrf.mxu2  ;;  %v1358_v57 = vpop.f32.mrf.mxu0 }
 0x1a2   : > { %2203 = vst [vmem:[%s3324_s8 + $0xe8] sm:$0xff] %v2139_v49  ;;  %v1695_v55 = vadd.f32 %v1694_v52, %v1526_v48  ;;  %v1527_v60 = vpop.f32.mrf.mxu1 }
 0x1a3   : > { %v1528_v1 = vadd.f32 %v1527_v60, %v1358_v57 }
 0x1a4   : > { %v2008_v8 = vmul.f32 %v3574_v11, %v1695_v55 }
 0x1a6   : > { %v2076_v62 = vadd.f32 %v3582_v6, %v2008_v8 }
 0x1a7   : > { %v3601_v2 = vpop.f32.mrf.mxu3 }
 0x1a8   : > { %v2140_v63 = vmax.f32 %v2076_v62, 0.0 }
 0x1a9   : > { %v1696_v4 = vpop.f32.mrf.mxu2  ;;  %v1361_v13 = vpop.f32.mrf.mxu0 }
 0x1aa   : > { %2204 = vst [vmem:[%s3324_s8 + $0xf0] sm:$0xff] %v2140_v63  ;;  %v1697_v12 = vadd.f32 %v1696_v4, %v1528_v1  ;;  %v1530_v14 = vpop.f32.mrf.mxu1  ;;  %v1576_v4 = vadd.f32 %v3478_v9, %v3334_v39  ;;  %v1578_v9 = vadd.f32 %v3491_v34, %v3347_v56 }
 0x1ab   : > { %v1531_v21 = vadd.f32 %v1530_v14, %v1361_v13 }
 0x1ac   : > { %v2009_v17 = vmul.f32 %v3574_v11, %v1697_v12 }
 0x1ae   : > { %v2077_v19 = vadd.f32 %v3582_v6, %v2009_v17 }
 0x1af   : > { %v1739_v25 = vpop.f32.mrf.mxu3 }
 0x1b0   : > { %v2141_v24 = vmax.f32 %v2077_v19, 0.0  ;;  %v1740_v29 = vadd.f32 %v1739_v25, %v1571_v22 }
 0x1b1   : > { %v1699_v28 = vpop.f32.mrf.mxu2  ;;  %v1363_v33 = vpop.f32.mrf.mxu0 }
 0x1b2   : > { %2205 = vst [vmem:[%s3324_s8 + $0xf8] sm:$0xff] %v2141_v24  ;;  %v1700_v31 = vadd.f32 %v1699_v28, %v1531_v21  ;;  %v2026_v37 = vmul.f32 %v3574_v11, %v1740_v29  ;;  %v1532_v41 = vpop.f32.mrf.mxu1 }
 0x1b3   : > { %v1533_v48 = vadd.f32 %v1532_v41, %v1363_v33 }
 0x1b4   : > { %v2010_v42 = vmul.f32 %v3574_v11, %v1700_v31  ;;  %v2094_v43 = vadd.f32 %v3582_v6, %v2026_v37 }
 0x1b6   : > { %v2078_v44 = vadd.f32 %v3582_v6, %v2010_v42  ;;  %v2158_v32 = vmax.f32 %v2094_v43, 0.0 }
 0x1b7   : > { %v1741_v49 = vpop.f32.mrf.mxu3 }
 0x1b8   : > { %v2142_v46 = vmax.f32 %v2078_v44, 0.0  ;;  %2222 = vst [vmem:[%s3324_s8 + $0x180] sm:$0xff] %v2158_v32  ;;  %v1742_v55 = vadd.f32 %v1741_v49, %v1573_v7 }
 0x1b9   : > { %v1701_v52 = vpop.f32.mrf.mxu2  ;;  %v1366_v60 = vpop.f32.mrf.mxu0 }
 0x1ba   : > { %2206 = vst [vmem:[%s3324_s8 + $0x100] sm:$0xff] %v2142_v46  ;;  %v1702_v57 = vadd.f32 %v1701_v52, %v1533_v48  ;;  %v2027_v8 = vmul.f32 %v3574_v11, %v1742_v55  ;;  %v1535_v62 = vpop.f32.mrf.mxu1  ;;  %v1581_v52 = vadd.f32 %v3496_v51, %v3352_v5  ;;  %v1583_v51 = vadd.f32 %v3509_v16, %v3365_v23 }
 0x1bb   : > { %v1536_v53 = vadd.f32 %v1535_v62, %v1366_v60 }
 0x1bc   : > { %v2011_v63 = vmul.f32 %v3574_v11, %v1702_v57  ;;  %v2095_v1 = vadd.f32 %v3582_v6, %v2027_v8 }
 0x1be   : > { %v2079_v26 = vadd.f32 %v3582_v6, %v2011_v63  ;;  %v2159_v12 = vmax.f32 %v2095_v1, 0.0 }
 0x1bf   : > { %v1744_v14 = vpop.f32.mrf.mxu3 }
 0x1c0   : > { %v2143_v13 = vmax.f32 %v2079_v26, 0.0  ;;  %2223 = vst [vmem:[%s3324_s8 + $0x188] sm:$0xff] %v2159_v12  ;;  %v1745_v19 = vadd.f32 %v1744_v14, %v1576_v4 }
 0x1c1   : > { %v1704_v17 = vpop.f32.mrf.mxu2  ;;  %v1368_v22 = vpop.f32.mrf.mxu0 }
 0x1c2   : > { %2207 = vst [vmem:[%s3324_s8 + $0x108] sm:$0xff] %v2143_v13  ;;  %v1705_v21 = vadd.f32 %v1704_v17, %v1536_v53  ;;  %v2028_v24 = vmul.f32 %v3574_v11, %v1745_v19  ;;  %v1537_v25 = vpop.f32.mrf.mxu1 }
 0x1c3   : > { %v1538_v37 = vadd.f32 %v1537_v25, %v1368_v22 }
 0x1c4   : > { %v2012_v28 = vmul.f32 %v3574_v11, %v1705_v21  ;;  %v2096_v29 = vadd.f32 %v3582_v6, %v2028_v24 }
 0x1c6   : > { %v2080_v39 = vadd.f32 %v3582_v6, %v2012_v28  ;;  %v2160_v31 = vmax.f32 %v2096_v29, 0.0 }
 0x1c7   : > { %v1746_v41 = vpop.f32.mrf.mxu3 }
 0x1c8   : > { %v2144_v33 = vmax.f32 %v2080_v39, 0.0  ;;  %2224 = vst [vmem:[%s3324_s8 + $0x190] sm:$0xff] %v2160_v31  ;;  %v1747_v43 = vadd.f32 %v1746_v41, %v1578_v9  ;;  %v1586_v31 = vadd.f32 %v3514_v35, %v3370_v40  ;;  %v1588_v35 = vadd.f32 %v3527_v61, %v3383_v58 }
 0x1c9   : > { %v1706_v42 = vpop.f32.mrf.mxu2  ;;  %v1371_v7 = vpop.f32.mrf.mxu0 }
 0x1ca   : > { %2208 = vst [vmem:[%s3324_s8 + $0x110] sm:$0xff] %v2144_v33  ;;  %v1707_v44 = vadd.f32 %v1706_v42, %v1538_v37  ;;  %v2029_v32 = vmul.f32 %v3574_v11, %v1747_v43  ;;  %v1540_v46 = vpop.f32.mrf.mxu1 }
 0x1cb   : > { %v1541_v34 = vadd.f32 %v1540_v46, %v1371_v7 }
 0x1cc   : > { %v2013_v48 = vmul.f32 %v3574_v11, %v1707_v44  ;;  %v2097_v49 = vadd.f32 %v3582_v6, %v2029_v32 }
 0x1ce   : > { %v2081_v56 = vadd.f32 %v3582_v6, %v2013_v48  ;;  %v2161_v55 = vmax.f32 %v2097_v49, 0.0 }
 0x1cf   : > { %v1749_v60 = vpop.f32.mrf.mxu3 }
 0x1d0   : > { %v2145_v57 = vmax.f32 %v2081_v56, 0.0  ;;  %2225 = vst [vmem:[%s3324_s8 + $0x198] sm:$0xff] %v2161_v55  ;;  %v1750_v62 = vadd.f32 %v1749_v60, %v1581_v52 }
 0x1d1   : > { %v1709_v8 = vpop.f32.mrf.mxu2  ;;  %v1373_v1 = vpop.f32.mrf.mxu0 }
 0x1d2   : > { %2209 = vst [vmem:[%s3324_s8 + $0x118] sm:$0xff] %v2145_v57  ;;  %v1710_v63 = vadd.f32 %v1709_v8, %v1541_v34  ;;  %v2030_v26 = vmul.f32 %v3574_v11, %v1750_v62  ;;  %v1542_v53 = vpop.f32.mrf.mxu1 }
 0x1d3   : > { %v1543_v17 = vadd.f32 %v1542_v53, %v1373_v1 }
 0x1d4   : > { %v2014_v4 = vmul.f32 %v3574_v11, %v1710_v63  ;;  %v2098_v12 = vadd.f32 %v3582_v6, %v2030_v26 }
 0x1d6   : > { %v2082_v5 = vadd.f32 %v3582_v6, %v2014_v4  ;;  %v2162_v13 = vmax.f32 %v2098_v12, 0.0  ;;  %v1591_v4 = vadd.f32 %v3532_v20, %v3388_v10  ;;  %v1593_v20 = vadd.f32 %v3545_v47, %v3401_v30 }
 0x1d7   : > { %v1751_v19 = vpop.f32.mrf.mxu3 }
 0x1d8   : > { %v2146_v14 = vmax.f32 %v2082_v5, 0.0  ;;  %2226 = vst [vmem:[%s3324_s8 + $0x1a0] sm:$0xff] %v2162_v13  ;;  %v1752_v22 = vadd.f32 %v1751_v19, %v1583_v51 }
 0x1d9   : > { %v1711_v21 = vpop.f32.mrf.mxu2  ;;  %v1376_v25 = vpop.f32.mrf.mxu0 }
 0x1da   : > { %2210 = vst [vmem:[%s3324_s8 + $0x120] sm:$0xff] %v2146_v14  ;;  %v1712_v24 = vadd.f32 %v1711_v21, %v1543_v17  ;;  %v2031_v28 = vmul.f32 %v3574_v11, %v1752_v22  ;;  %v1545_v29 = vpop.f32.mrf.mxu1 }
 0x1db   : > { %v1546_v16 = vadd.f32 %v1545_v29, %v1376_v25 }
 0x1dc   : > { %v2015_v39 = vmul.f32 %v3574_v11, %v1712_v24  ;;  %v2099_v9 = vadd.f32 %v3582_v6, %v2031_v28 }
 0x1de   : > { %v2083_v23 = vadd.f32 %v3582_v6, %v2015_v39  ;;  %v2163_v33 = vmax.f32 %v2099_v9, 0.0 }
 0x1df   : > { %v1754_v41 = vpop.f32.mrf.mxu3 }
 0x1e0   : > { %v2147_v37 = vmax.f32 %v2083_v23, 0.0  ;;  %2227 = vst [vmem:[%s3324_s8 + $0x1a8] sm:$0xff] %v2163_v33  ;;  %v1755_v43 = vadd.f32 %v1754_v41, %v1586_v31 }
 0x1e1   : > { %v1714_v42 = vpop.f32.mrf.mxu2  ;;  %v1378_v7 = vpop.f32.mrf.mxu0 }
 0x1e2   : > { %2211 = vst [vmem:[%s3324_s8 + $0x128] sm:$0xff] %v2147_v37  ;;  %v1715_v44 = vadd.f32 %v1714_v42, %v1546_v16  ;;  %v2032_v32 = vmul.f32 %v3574_v11, %v1755_v43  ;;  %v1547_v46 = vpop.f32.mrf.mxu1 }
 0x1e3   : > { %v1548_v52 = vadd.f32 %v1547_v46, %v1378_v7 }
 0x1e4   : > { %v2016_v48 = vmul.f32 %v3574_v11, %v1715_v44  ;;  %v2100_v49 = vadd.f32 %v3582_v6, %v2032_v32  ;;  %v1596_v44 = vadd.f32 %v3550_v3, %v3406_v45  ;;  %v1598_v3 = vadd.f32 %v3563_v36, %v3419_v0 }
 0x1e6   : > { %v2084_v40 = vadd.f32 %v3582_v6, %v2016_v48  ;;  %v2164_v56 = vmax.f32 %v2100_v49, 0.0 }
 0x1e7   : > { %v1756_v55 = vpop.f32.mrf.mxu3 }
 0x1e8   : > { %v2148_v34 = vmax.f32 %v2084_v40, 0.0  ;;  %2228 = vst [vmem:[%s3324_s8 + $0x1b0] sm:$0xff] %v2164_v56  ;;  %v1757_v60 = vadd.f32 %v1756_v55, %v1588_v35 }
 0x1e9   : > { %v1716_v57 = vpop.f32.mrf.mxu2  ;;  %v1381_v62 = vpop.f32.mrf.mxu0 }
 0x1ea   : > { %2212 = vst [vmem:[%s3324_s8 + $0x130] sm:$0xff] %v2148_v34  ;;  %v1717_v8 = vadd.f32 %v1716_v57, %v1548_v52  ;;  %v2033_v63 = vmul.f32 %v3574_v11, %v1757_v60  ;;  %v1550_v1 = vpop.f32.mrf.mxu1 }
 0x1eb   : > { %v1551_v61 = vadd.f32 %v1550_v1, %v1381_v62 }
 0x1ec   : > { %v2017_v26 = vmul.f32 %v3574_v11, %v1717_v8  ;;  %v2101_v53 = vadd.f32 %v3582_v6, %v2033_v63 }
 0x1ee   : > { %v2085_v58 = vadd.f32 %v3582_v6, %v2017_v26  ;;  %v2165_v12 = vmax.f32 %v2101_v53, 0.0 }
 0x1ef   : > { %v1759_v51 = vpop.f32.mrf.mxu3 }
 0x1f0   : > { %v2149_v5 = vmax.f32 %v2085_v58, 0.0  ;;  %2229 = vst [vmem:[%s3324_s8 + $0x1b8] sm:$0xff] %v2165_v12  ;;  %v1760_v14 = vadd.f32 %v1759_v51, %v1591_v4 }
 0x1f1   : > { %v1719_v13 = vpop.f32.mrf.mxu2  ;;  %v1383_v19 = vpop.f32.mrf.mxu0 }
 0x1f2   : > { %2213 = vst [vmem:[%s3324_s8 + $0x138] sm:$0xff] %v2149_v5  ;;  %v1720_v17 = vadd.f32 %v1719_v13, %v1551_v61  ;;  %v2034_v21 = vmul.f32 %v3574_v11, %v1760_v14  ;;  %v1552_v22 = vpop.f32.mrf.mxu1  ;;  %v1601_v5 = vadd.f32 %v3568_v59, %v3424_v18  ;;  %v1603_v59 = vadd.f32 %v3591_v27, %v3437_v38 }
 0x1f3   : > { %v1553_v39 = vadd.f32 %v1552_v22, %v1383_v19 }
 0x1f4   : > { %v2018_v24 = vmul.f32 %v3574_v11, %v1720_v17  ;;  %v2102_v25 = vadd.f32 %v3582_v6, %v2034_v21 }
 0x1f6   : > { %v2086_v10 = vadd.f32 %v3582_v6, %v2018_v24  ;;  %v2166_v28 = vmax.f32 %v2102_v25, 0.0 }
 0x1f7   : > { %v1761_v9 = vpop.f32.mrf.mxu3 }
 0x1f8   : > { %v2150_v29 = vmax.f32 %v2086_v10, 0.0  ;;  %2230 = vst [vmem:[%s3324_s8 + $0x1c0] sm:$0xff] %v2166_v28  ;;  %v1762_v16 = vadd.f32 %v1761_v9, %v1593_v20 }
 0x1f9   : > { %v1721_v23 = vpop.f32.mrf.mxu2  ;;  %v1386_v33 = vpop.f32.mrf.mxu0 }
 0x1fa   : > { %2214 = vst [vmem:[%s3324_s8 + $0x140] sm:$0xff] %v2150_v29  ;;  %v1722_v31 = vadd.f32 %v1721_v23, %v1553_v39  ;;  %v2035_v37 = vmul.f32 %v3574_v11, %v1762_v16  ;;  %v1555_v41 = vpop.f32.mrf.mxu1 }
 0x1fb   : > { %v1556_v47 = vadd.f32 %v1555_v41, %v1386_v33 }
 0x1fc   : > { %v2019_v42 = vmul.f32 %v3574_v11, %v1722_v31  ;;  %v2103_v43 = vadd.f32 %v3582_v6, %v2035_v37 }
 0x1fe   : > { %v2087_v30 = vadd.f32 %v3582_v6, %v2019_v42  ;;  %v2167_v7 = vmax.f32 %v2103_v43, 0.0 }
 0x1ff   : > { %v1764_v46 = vpop.f32.mrf.mxu3 }
 0x200   : > { %v2151_v32 = vmax.f32 %v2087_v30, 0.0  ;;  %2231 = vst [vmem:[%s3324_s8 + $0x1c8] sm:$0xff] %v2167_v7  ;;  %v1765_v49 = vadd.f32 %v1764_v46, %v1596_v44  ;;  %v1606_v30 = vadd.f32 %v3596_v50, %v3442_v54  ;;  %v1608_v50 = vadd.f32 %v3601_v2, %v3455_v15 }
 0x201   : > { %v1724_v48 = vpop.f32.mrf.mxu2  ;;  %v1388_v35 = vpop.f32.mrf.mxu0 }
 0x202   : > { %2215 = vst [vmem:[%s3324_s8 + $0x148] sm:$0xff] %v2151_v32  ;;  %v1725_v40 = vadd.f32 %v1724_v48, %v1556_v47  ;;  %v2036_v56 = vmul.f32 %v3574_v11, %v1765_v49  ;;  %v1557_v34 = vpop.f32.mrf.mxu1 }
 0x203   : > { %v1558_v8 = vadd.f32 %v1557_v34, %v1388_v35 }
 0x204   : > { %v2020_v52 = vmul.f32 %v3574_v11, %v1725_v40  ;;  %v2104_v55 = vadd.f32 %v3582_v6, %v2036_v56 }
 0x206   : > { %v2088_v45 = vadd.f32 %v3582_v6, %v2020_v52  ;;  %v2168_v57 = vmax.f32 %v2104_v55, 0.0 }
 0x207   : > { %v1766_v62 = vpop.f32.mrf.mxu3 }
 0x208   : > { %v2152_v60 = vmax.f32 %v2088_v45, 0.0  ;;  %2232 = vst [vmem:[%s3324_s8 + $0x1d0] sm:$0xff] %v2168_v57  ;;  %v1767_v1 = vadd.f32 %v1766_v62, %v1598_v3 }
 0x209   : > { %v1726_v63 = vpop.f32.mrf.mxu2  ;;  %v1391_v53 = vpop.f32.mrf.mxu0 }
 0x20a   : > { %2216 = vst [vmem:[%s3324_s8 + $0x150] sm:$0xff] %v2152_v60  ;;  %v1727_v26 = vadd.f32 %v1726_v63, %v1558_v8  ;;  %v2037_v58 = vmul.f32 %v3574_v11, %v1767_v1  ;;  %v1560_v61 = vpop.f32.mrf.mxu1 }
 0x20b   : > { %v1561_v36 = vadd.f32 %v1560_v61, %v1391_v53 }
 0x20c   : > { %v2021_v4 = vmul.f32 %v3574_v11, %v1727_v26  ;;  %v2105_v12 = vadd.f32 %v3582_v6, %v2037_v58 }
 0x20e   : > { %v2089_v0 = vadd.f32 %v3582_v6, %v2021_v4  ;;  %v2169_v51 = vmax.f32 %v2105_v12, 0.0 }
 0x20f   : > { %v1769_v14 = vpop.f32.mrf.mxu3 }
 0x210   : > { %v2153_v13 = vmax.f32 %v2089_v0, 0.0  ;;  %2233 = vst [vmem:[%s3324_s8 + $0x1d8] sm:$0xff] %v2169_v51  ;;  %v1770_v19 = vadd.f32 %v1769_v14, %v1601_v5 }
 0x211   : > { %v1729_v17 = vpop.f32.mrf.mxu2  ;;  %v1393_v22 = vpop.f32.mrf.mxu0 }
 0x212   : > { %2217 = vst [vmem:[%s3324_s8 + $0x158] sm:$0xff] %v2153_v13  ;;  %v1730_v21 = vadd.f32 %v1729_v17, %v1561_v36  ;;  %v2038_v24 = vmul.f32 %v3574_v11, %v1770_v19  ;;  %v1562_v25 = vpop.f32.mrf.mxu1 }
 0x213   : > { %v1563_v39 = vadd.f32 %v1562_v25, %v1393_v22 }
 0x214   : > { %v2022_v10 = vmul.f32 %v3574_v11, %v1730_v21  ;;  %v2106_v20 = vadd.f32 %v3582_v6, %v2038_v24 }
 0x216   : > { %v2090_v18 = vadd.f32 %v3582_v6, %v2022_v10  ;;  %v2170_v28 = vmax.f32 %v2106_v20, 0.0 }
 0x217   : > { %v1771_v9 = vpop.f32.mrf.mxu3 }
 0x218   : > { %v2154_v29 = vmax.f32 %v2090_v18, 0.0  ;;  %2234 = vst [vmem:[%s3324_s8 + $0x1e0] sm:$0xff] %v2170_v28  ;;  %v1772_v16 = vadd.f32 %v1771_v9, %v1603_v59 }
 0x219   : > { %v1731_v23 = vpop.f32.mrf.mxu2  ;;  %v1396_v37 = vpop.f32.mrf.mxu0 }
 0x21a   : > { %2218 = vst [vmem:[%s3324_s8 + $0x160] sm:$0xff] %v2154_v29  ;;  %v1732_v31 = vadd.f32 %v1731_v23, %v1563_v39  ;;  %v2039_v33 = vmul.f32 %v3574_v11, %v1772_v16  ;;  %v1565_v41 = vpop.f32.mrf.mxu1 }
 0x21b   : > { %v1566_v27 = vadd.f32 %v1565_v41, %v1396_v37 }
 0x21c   : > { %v2023_v42 = vmul.f32 %v3574_v11, %v1732_v31  ;;  %v2107_v43 = vadd.f32 %v3582_v6, %v2039_v33 }
 0x21e   : > { %v2091_v38 = vadd.f32 %v3582_v6, %v2023_v42  ;;  %v2171_v47 = vmax.f32 %v2107_v43, 0.0 }
 0x21f   : > { %v1774_v7 = vpop.f32.mrf.mxu3 }
 0x220   : > { %v2155_v44 = vmax.f32 %v2091_v38, 0.0  ;;  %2235 = vst [vmem:[%s3324_s8 + $0x1e8] sm:$0xff] %v2171_v47  ;;  %v1775_v46 = vadd.f32 %v1774_v7, %v1606_v30 }
 0x221   : > { %v1734_v32 = vpop.f32.mrf.mxu2  ;;  %v1398_v56 = vpop.f32.mrf.mxu0 }
 0x222   : > { %2219 = vst [vmem:[%s3324_s8 + $0x168] sm:$0xff] %v2155_v44  ;;  %v1735_v48 = vadd.f32 %v1734_v32, %v1566_v27  ;;  %v2040_v49 = vmul.f32 %v3574_v11, %v1775_v46  ;;  %v1567_v34 = vpop.f32.mrf.mxu1 }
 0x223   : > { %v1568_v45 = vadd.f32 %v1567_v34, %v1398_v56 }
 0x224   : > { %v2024_v40 = vmul.f32 %v3574_v11, %v1735_v48  ;;  %v2108_v35 = vadd.f32 %v3582_v6, %v2040_v49 }
 0x226   : > { %v2092_v54 = vadd.f32 %v3582_v6, %v2024_v40  ;;  %v2172_v52 = vmax.f32 %v2108_v35, 0.0 }
 0x227   : > { %v1776_v3 = vpop.f32.mrf.mxu3 }
 0x228   : > { %v2156_v55 = vmax.f32 %v2092_v54, 0.0  ;;  %2236 = vst [vmem:[%s3324_s8 + $0x1f0] sm:$0xff] %v2172_v52  ;;  %v1777_v60 = vadd.f32 %v1776_v3, %v1608_v50 }
 0x229   : > { %v1736_v57 = vpop.f32.mrf.mxu2 }
 0x22a   : > { %2220 = vst [vmem:[%s3324_s8 + $0x170] sm:$0xff] %v2156_v55  ;;  %v1737_v8 = vadd.f32 %v1736_v57, %v1568_v45  ;;  %v2041_v62 = vmul.f32 %v3574_v11, %v1777_v60 }
 0x22c   : > { %v2025_v63 = vmul.f32 %v3574_v11, %v1737_v8  ;;  %v2109_v1 = vadd.f32 %v3582_v6, %v2041_v62 }
 0x22e   : > { %v2093_v26 = vadd.f32 %v3582_v6, %v2025_v63  ;;  %v2173_v15 = vmax.f32 %v2109_v1, 0.0 }
 0x230   : > { %v2157_v2 = vmax.f32 %v2093_v26, 0.0  ;;  %2237 = vst [vmem:[%s3324_s8 + $0x1f8] sm:$0xff] %v2173_v15 }
 0x232   : > { %2221 = vst [vmem:[%s3324_s8 + $0x178] sm:$0xff] %v2157_v2 }
 0x233 PF: > { %s14_s17 = sadd.s32 1, %s3053_s17   ;;  %s3749_s15 = smov %s3049_s16 }
 0x234   : > { %p11_p5 = scmp.ge.s32.totalorder %s14_s17, 6   ;;  %s3750_s16 = smov %s3752_s18 }
 0x236   :  { %13 = sbr.rel (!%p11_p5) target bundleno = 2 (0x2), region = 83 }

</bundles_post_ra>
